<compile_context>
chip_gen: v6e
topology: v6e:2x2x1
jax: 0.10.0
libtpu: 0.0.40
codegen_flags: <defaults>
</compile_context>

<pallas_src>
import functools
import math

import jax
import jax.numpy as jnp
import numpy as np
from jax.experimental import pallas as pl
from jax.experimental.pallas import tpu as pltpu


_LN_EPS = 1e-5
_GELU_C = math.sqrt(2.0 / math.pi)


# ----------------------------- shared math helpers ---------------------------

def _gelu(x):
    return 0.5 * x * (1.0 + jnp.tanh(_GELU_C * (x + 0.044715 * x * x * x)))


def _layernorm(z, gamma, beta):
    mu = jnp.mean(z, axis=-1, keepdims=True)
    c = z - mu
    var = jnp.mean(c * c, axis=-1, keepdims=True)
    return c * jax.lax.rsqrt(var + _LN_EPS) * gamma + beta


def _softmax_last(s):
    s = s - jnp.max(s, axis=-1, keepdims=True)
    e = jnp.exp(s)
    return e / jnp.sum(e, axis=-1, keepdims=True)


def _dot(a, b):
    return jnp.dot(a, b, preferred_element_type=jnp.float32)


# --------------------------------- kernel ------------------------------------

def transformer_kernel(x_ref, g1_ref, be1_ref, wqkv_ref, bqkv_ref, wo_ref, bo_ref,
                       g2_ref, be2_ref, w1_ref, b1_ref, w2_ref, b2_ref,
                       ox_ref, oattn_ref, *, heads, dim_head):
    li = pl.program_id(1)                 # layer index (depth axis, sequential)
    last = pl.num_programs(1) - 1

    # Initialize the resident per-batch residual stream from the input at layer 0.
    @pl.when(li == 0)
    def _():
        ox_ref[...] = x_ref[...]

    x = ox_ref[0]                                          # (n, dim), carried across layers

    # ---------------- PreNorm + multi-head attention --------------------------
    y = _layernorm(x, g1_ref[0], be1_ref[0])
    # single fused QKV projection for ALL heads: (n, dim) @ (dim, 3*inner)
    qkv = _dot(y, wqkv_ref[0]) + bqkv_ref[0]               # (n, 3*inner)

    inner = heads * dim_head
    scale = 1.0 / math.sqrt(dim_head)

    head_outs = []
    attn_maps = []
    for h in range(heads):                                  # static unrolled head loop
        qh = qkv[:, h * dim_head:(h + 1) * dim_head]
        kh = qkv[:, inner + h * dim_head: inner + (h + 1) * dim_head]
        vh = qkv[:, 2 * inner + h * dim_head: 2 * inner + (h + 1) * dim_head]
        dots = jax.lax.dot_general(qh, kh, (((1,), (1,)), ((), ())),
                                   preferred_element_type=jnp.float32) * scale
        attn_h = _softmax_last(dots)                        # (n, n)
        attn_maps.append(attn_h)
        head_outs.append(_dot(attn_h, vh))                  # (n, dim_head)
    attn_out = jnp.concatenate(head_outs, axis=-1)          # (n, inner)

    # The module only returns the LAST layer's attention map -> write it once.
    @pl.when(li == last)
    def _():
        for h in range(heads):
            oattn_ref[0, h] = attn_maps[h]

    # single output projection for all heads + residual
    x = x + _dot(attn_out, wo_ref[0]) + bo_ref[0]

    # ---------------- PreNorm + FeedForward ------------------------------------
    y2 = _layernorm(x, g2_ref[0], be2_ref[0])
    h1 = _gelu(_dot(y2, w1_ref[0]) + b1_ref[0])
    x = x + _dot(h1, w2_ref[0]) + b2_ref[0]

    # single write of the updated residual stream (stays resident until last layer)
    ox_ref[0] = x


# --------------------------------- wrapper ------------------------------------

def c_transformer_forward(x, stacked, *, heads, dim_head, depth):
    b, n, dim = x.shape
    inner = heads * dim_head
    mlp_dim = stacked['w1'].shape[-1]

    kernel = functools.partial(transformer_kernel, heads=heads, dim_head=dim_head)

    def wspec(shape):
        return pl.BlockSpec(shape, lambda bi, li: (li,) + (0,) * (len(shape) - 1))

    out_x, out_attn = pl.pallas_call(
        kernel,
        out_shape=(jax.ShapeDtypeStruct((b, n, dim), jnp.float32),
                   jax.ShapeDtypeStruct((b, heads, n, n), jnp.float32)),
        grid=(b, depth),
        in_specs=[
            pl.BlockSpec((1, n, dim), lambda bi, li: (bi, 0, 0)),   # x
            wspec((1, 1, dim)),                 # ln1 gamma
            wspec((1, 1, dim)),                 # ln1 beta
            wspec((1, dim, 3 * inner)),         # Wqkv^T (packed q|k|v)
            wspec((1, 1, 3 * inner)),           # bqkv
            wspec((1, inner, dim)),             # Wo^T
            wspec((1, 1, dim)),                 # bo
            wspec((1, 1, dim)),                 # ln2 gamma
            wspec((1, 1, dim)),                 # ln2 beta
            wspec((1, dim, mlp_dim)),           # W1^T
            wspec((1, 1, mlp_dim)),             # b1
            wspec((1, mlp_dim, dim)),           # W2^T
            wspec((1, 1, dim)),                 # b2
        ],
        out_specs=(pl.BlockSpec((1, n, dim), lambda bi, li: (bi, 0, 0)),
                   pl.BlockSpec((1, heads, n, n), lambda bi, li: (bi, 0, 0, 0))),
        compiler_params=pltpu.CompilerParams(
            dimension_semantics=("parallel", "arbitrary")),
    )(x.astype(jnp.float32),
      stacked['g1'], stacked['be1'], stacked['wqkv'], stacked['bqkv'],
      stacked['wo'], stacked['bo'], stacked['g2'], stacked['be2'],
      stacked['w1'], stacked['b1'], stacked['w2'], stacked['b2'])
    return out_x, out_attn


def stack_params(layers):
    g = lambda key: jnp.stack([p[key] for p in layers])
    wq, wk, wv = g('wq'), g('wk'), g('wv')                           # (depth, inner, dim)
    wqkv = jnp.concatenate([jnp.swapaxes(wq, 1, 2),
                            jnp.swapaxes(wk, 1, 2),
                            jnp.swapaxes(wv, 1, 2)], axis=-1)        # (depth, dim, 3*inner)
    bqkv = jnp.concatenate([g('bq'), g('bk'), g('bv')], axis=-1)[:, None, :]
    return dict(
        g1=g('ln1_w')[:, None, :], be1=g('ln1_b')[:, None, :],
        wqkv=wqkv, bqkv=bqkv,
        wo=jnp.swapaxes(g('wo'), 1, 2), bo=g('bo')[:, None, :],
        g2=g('ln2_w')[:, None, :], be2=g('ln2_b')[:, None, :],
        w1=jnp.swapaxes(g('w1'), 1, 2), b1=g('b1')[:, None, :],
        w2=jnp.swapaxes(g('w2'), 1, 2), b2=g('b2')[:, None, :],
    )


# ------------------------- pure-JAX reference (for check) ---------------------

def reference_forward(x, layers, *, heads, dim_head):
    b, n, dim = x.shape
    scale = 1.0 / math.sqrt(dim_head)
    attn = None
    for p in layers:
        y = _layernorm(x, p['ln1_w'], p['ln1_b'])
        q = y @ p['wq'].T + p['bq']
        k = y @ p['wk'].T + p['bk']
        v = y @ p['wv'].T + p['bv']

        def split_heads(t):
            return t.reshape(b, n, heads, dim_head).transpose(0, 2, 1, 3)

        qh, kh, vh = split_heads(q), split_heads(k), split_heads(v)
        dots = jnp.einsum('bhid,bhjd->bhij', qh, kh) * scale
        attn = jax.nn.softmax(dots, axis=-1)
        out = jnp.einsum('bhij,bhjd->bhid', attn, vh)
        out = out.transpose(0, 2, 1, 3).reshape(b, n, heads * dim_head)
        x = out @ p['wo'].T + p['bo'] + x

        y2 = _layernorm(x, p['ln2_w'], p['ln2_b'])
        h1 = _gelu(y2 @ p['w1'].T + p['b1'])
        x = h1 @ p['w2'].T + p['b2'] + x
    return x, attn


# ----------------------------------- main -------------------------------------

if __name__ == "__main__":
    # module hyperparameters
    dim, depth, heads, dim_head, mlp_dim = 32, 2, 4, 8, 64
    inner = heads * dim_head
    b, n = 2, 8

    key = jax.random.PRNGKey(0)
    key, kx = jax.random.split(key)
    x = jax.random.normal(kx, (b, n, dim), dtype=jnp.float32)

    def linear_init(k, out_f, in_f):
        kw, kb = jax.random.split(k)
        lim = 1.0 / math.sqrt(in_f)
        w = jax.random.uniform(kw, (out_f, in_f), jnp.float32, -lim, lim)
        bias = jax.random.uniform(kb, (out_f,), jnp.float32, -lim, lim)
        return w, bias

    layers = []
    for _ in range(depth):
        key, k1, k2, k3, k4, k5, k6, k7, k8, k9, k10 = jax.random.split(key, 11)
        wq, bq = linear_init(k1, inner, dim)
        wk, bk = linear_init(k2, inner, dim)
        wv, bv = linear_init(k3, inner, dim)
        wo, bo = linear_init(k4, dim, inner)
        w1, b1 = linear_init(k5, mlp_dim, dim)
        w2, b2 = linear_init(k6, dim, mlp_dim)
        ln1_w = 1.0 + 0.05 * jax.random.normal(k7, (dim,), jnp.float32)
        ln1_b = 0.05 * jax.random.normal(k8, (dim,), jnp.float32)
        ln2_w = 1.0 + 0.05 * jax.random.normal(k9, (dim,), jnp.float32)
        ln2_b = 0.05 * jax.random.normal(k10, (dim,), jnp.float32)
        layers.append(dict(ln1_w=ln1_w, ln1_b=ln1_b, wq=wq, bq=bq, wk=wk, bk=bk,
                           wv=wv, bv=bv, wo=wo, bo=bo, ln2_w=ln2_w, ln2_b=ln2_b,
                           w1=w1, b1=b1, w2=w2, b2=b2))

    stacked = stack_params(layers)

    out_x, out_attn = c_transformer_forward(x, stacked, heads=heads,
                                            dim_head=dim_head, depth=depth)
    out_x = jax.block_until_ready(out_x)
    out_attn = jax.block_until_ready(out_attn)

    ref_x, ref_attn = reference_forward(x, layers, heads=heads, dim_head=dim_head)
    ref_x = jax.block_until_ready(ref_x)

    assert out_x.shape == (b, n, dim)
    assert out_attn.shape == (b, heads, n, n)
    np.testing.assert_allclose(np.asarray(out_x), np.asarray(ref_x),
                               rtol=1e-3, atol=1e-3)
    np.testing.assert_allclose(np.asarray(out_attn), np.asarray(ref_attn),
                               rtol=1e-3, atol=1e-3)

    print("KERNEL_OK")
</pallas_src>

<mosaic_0001>
module attributes {stable_mosaic.version = 11 : i64} {
  func.func @transformer_kernel(%arg0: i32, %arg1: i32, %arg2: memref<1x8x32xf32, #tpu.memory_space<vmem>>, %arg3: memref<1x1x32xf32, #tpu.memory_space<vmem>>, %arg4: memref<1x1x32xf32, #tpu.memory_space<vmem>>, %arg5: memref<1x32x96xf32, #tpu.memory_space<vmem>>, %arg6: memref<1x1x96xf32, #tpu.memory_space<vmem>>, %arg7: memref<1x32x32xf32, #tpu.memory_space<vmem>>, %arg8: memref<1x1x32xf32, #tpu.memory_space<vmem>>, %arg9: memref<1x1x32xf32, #tpu.memory_space<vmem>>, %arg10: memref<1x1x32xf32, #tpu.memory_space<vmem>>, %arg11: memref<1x32x64xf32, #tpu.memory_space<vmem>>, %arg12: memref<1x1x64xf32, #tpu.memory_space<vmem>>, %arg13: memref<1x64x32xf32, #tpu.memory_space<vmem>>, %arg14: memref<1x1x32xf32, #tpu.memory_space<vmem>>, %arg15: memref<1x8x32xf32, #tpu.memory_space<vmem>>, %arg16: memref<1x4x8x8xf32, #tpu.memory_space<vmem>>) attributes {dimension_semantics = [#tpu.dimension_semantics<parallel>, #tpu.dimension_semantics<arbitrary>], iteration_bounds = array<i64: 2, 2>, scalar_prefetch = 0 : i64, scratch_operands = 0 : i64, tpu.core_type = #tpu.core_type<tc>, window_params = [{transform_indices = @transform_0, window_bounds = array<i64: 1, 8, 32>}, {transform_indices = @transform_1, window_bounds = array<i64: 1, 1, 32>}, {transform_indices = @transform_2, window_bounds = array<i64: 1, 1, 32>}, {transform_indices = @transform_3, window_bounds = array<i64: 1, 32, 96>}, {transform_indices = @transform_4, window_bounds = array<i64: 1, 1, 96>}, {transform_indices = @transform_5, window_bounds = array<i64: 1, 32, 32>}, {transform_indices = @transform_6, window_bounds = array<i64: 1, 1, 32>}, {transform_indices = @transform_7, window_bounds = array<i64: 1, 1, 32>}, {transform_indices = @transform_8, window_bounds = array<i64: 1, 1, 32>}, {transform_indices = @transform_9, window_bounds = array<i64: 1, 32, 64>}, {transform_indices = @transform_10, window_bounds = array<i64: 1, 1, 64>}, {transform_indices = @transform_11, window_bounds = array<i64: 1, 64, 32>}, {transform_indices = @transform_12, window_bounds = array<i64: 1, 1, 32>}, {transform_indices = @transform_13, window_bounds = array<i64: 1, 8, 32>}, {transform_indices = @transform_14, window_bounds = array<i64: 1, 4, 8, 8>}]} {
    %c0_i32 = arith.constant 0 : i32
    %0 = arith.cmpi eq, %arg1, %c0_i32 : i32
    %1 = arith.extui %0 : i1 to i32
    %c0_i32_0 = arith.constant 0 : i32
    %2 = arith.cmpi ne, %1, %c0_i32_0 : i32
    scf.if %2 {
      %c0_80 = arith.constant 0 : index
      %c0_81 = arith.constant 0 : index
      %c0_82 = arith.constant 0 : index
      %167 = vector.load %arg2[%c0_80, %c0_81, %c0_82] : memref<1x8x32xf32, #tpu.memory_space<vmem>>, vector<1x8x32xf32>
      %c0_83 = arith.constant 0 : index
      %c0_84 = arith.constant 0 : index
      %c0_85 = arith.constant 0 : index
      %168 = vector.load %arg15[%c0_83, %c0_84, %c0_85] : memref<1x8x32xf32, #tpu.memory_space<vmem>>, vector<1x8x32xf32>
      tpu.vector_store %arg15[%c0_83, %c0_84, %c0_85], %167 {strides = array<i32>} : memref<1x8x32xf32, #tpu.memory_space<vmem>>, vector<1x8x32xf32>,
    } else {
    }
    %c0 = arith.constant 0 : index
    %c0_1 = arith.constant 0 : index
    %c0_2 = arith.constant 0 : index
    %3 = vector.load %arg15[%c0, %c0_1, %c0_2] : memref<1x8x32xf32, #tpu.memory_space<vmem>>, vector<1x8x32xf32>
    %4 = vector.shape_cast %3 : vector<1x8x32xf32> to vector<8x32xf32>
    %c0_3 = arith.constant 0 : index
    %c0_4 = arith.constant 0 : index
    %c0_5 = arith.constant 0 : index
    %5 = vector.load %arg3[%c0_3, %c0_4, %c0_5] : memref<1x1x32xf32, #tpu.memory_space<vmem>>, vector<1x1x32xf32>
    %6 = vector.shape_cast %5 : vector<1x1x32xf32> to vector<1x32xf32>
    %c0_6 = arith.constant 0 : index
    %c0_7 = arith.constant 0 : index
    %c0_8 = arith.constant 0 : index
    %7 = vector.load %arg4[%c0_6, %c0_7, %c0_8] : memref<1x1x32xf32, #tpu.memory_space<vmem>>, vector<1x1x32xf32>
    %8 = vector.shape_cast %7 : vector<1x1x32xf32> to vector<1x32xf32>
    %cst = arith.constant dense<0.000000e+00> : vector<8xf32>
    %9 = vector.multi_reduction <add>, %4, %cst [1] : vector<8x32xf32> to vector<8xf32>
    %10 = vector.shape_cast %9 : vector<8xf32> to vector<8x1xf32>
    %cst_9 = arith.constant 3.200000e+01 : f32
    %11 = vector.broadcast %cst_9 : f32 to vector<8x1xf32>
    %12 = arith.divf %10, %11 : vector<8x1xf32>
    %13 = vector.broadcast %12 : vector<8x1xf32> to vector<8x32xf32>
    %14 = arith.subf %4, %13 : vector<8x32xf32>
    %15 = arith.mulf %14, %14 : vector<8x32xf32>
    %cst_10 = arith.constant dense<0.000000e+00> : vector<8xf32>
    %16 = vector.multi_reduction <add>, %15, %cst_10 [1] : vector<8x32xf32> to vector<8xf32>
    %17 = vector.shape_cast %16 : vector<8xf32> to vector<8x1xf32>
    %cst_11 = arith.constant 3.200000e+01 : f32
    %18 = vector.broadcast %cst_11 : f32 to vector<8x1xf32>
    %19 = arith.divf %17, %18 : vector<8x1xf32>
    %cst_12 = arith.constant 9.99999974E-6 : f32
    %20 = vector.broadcast %cst_12 : f32 to vector<8x1xf32>
    %21 = arith.addf %19, %20 : vector<8x1xf32>
    %22 = math.rsqrt %21 : vector<8x1xf32>
    %23 = vector.broadcast %22 : vector<8x1xf32> to vector<8x32xf32>
    %24 = arith.mulf %14, %23 : vector<8x32xf32>
    %25 = vector.broadcast %6 : vector<1x32xf32> to vector<8x32xf32>
    %26 = arith.mulf %24, %25 : vector<8x32xf32>
    %27 = vector.broadcast %8 : vector<1x32xf32> to vector<8x32xf32>
    %28 = arith.addf %26, %27 : vector<8x32xf32>
    %c0_13 = arith.constant 0 : index
    %c0_14 = arith.constant 0 : index
    %c0_15 = arith.constant 0 : index
    %29 = vector.load %arg5[%c0_13, %c0_14, %c0_15] : memref<1x32x96xf32, #tpu.memory_space<vmem>>, vector<1x32x96xf32>
    %30 = vector.shape_cast %29 : vector<1x32x96xf32> to vector<32x96xf32>
    %cst_16 = arith.constant dense<0.000000e+00> : vector<8x96xf32>
    %31 = tpu.matmul %28, %30, %cst_16 {dimension_numbers = #tpu.dot_dimension_numbers<[1], [0], [0], [1], [0, 0, 1, 1], [], []>} : vector<8x32xf32>, vector<32x96xf32>, vector<8x96xf32> -> vector<8x96xf32>
    %c0_17 = arith.constant 0 : index
    %c0_18 = arith.constant 0 : index
    %c0_19 = arith.constant 0 : index
    %32 = vector.load %arg6[%c0_17, %c0_18, %c0_19] : memref<1x1x96xf32, #tpu.memory_space<vmem>>, vector<1x1x96xf32>
    %33 = vector.shape_cast %32 : vector<1x1x96xf32> to vector<1x96xf32>
    %34 = vector.broadcast %33 : vector<1x96xf32> to vector<8x96xf32>
    %35 = arith.addf %31, %34 : vector<8x96xf32>
    %36 = vector.extract_strided_slice %35 {offsets = [0, 0], sizes = [8, 8], strides = [1, 1]} : vector<8x96xf32> to vector<8x8xf32>
    %37 = vector.extract_strided_slice %35 {offsets = [0, 32], sizes = [8, 8], strides = [1, 1]} : vector<8x96xf32> to vector<8x8xf32>
    %38 = vector.extract_strided_slice %35 {offsets = [0, 64], sizes = [8, 8], strides = [1, 1]} : vector<8x96xf32> to vector<8x8xf32>
    %cst_20 = arith.constant dense<0.000000e+00> : vector<8x8xf32>
    %39 = tpu.matmul %36, %37, %cst_20 {dimension_numbers = #tpu.dot_dimension_numbers<[1], [1], [0], [0], [0, 0, 1, 0], [], []>} : vector<8x8xf32>, vector<8x8xf32>, vector<8x8xf32> -> vector<8x8xf32>
    %cst_21 = arith.constant 0.353553385 : f32
    %40 = vector.broadcast %cst_21 : f32 to vector<8x8xf32>
    %41 = arith.mulf %39, %40 : vector<8x8xf32>
    %cst_22 = arith.constant dense<0xFF800000> : vector<8xf32>
    %42 = vector.multi_reduction <maximumf>, %41, %cst_22 [1] : vector<8x8xf32> to vector<8xf32>
    %43 = vector.shape_cast %42 : vector<8xf32> to vector<8x1xf32>
    %44 = vector.broadcast %43 : vector<8x1xf32> to vector<8x8xf32>
    %45 = arith.subf %41, %44 : vector<8x8xf32>
    %46 = math.exp %45 : vector<8x8xf32>
    %cst_23 = arith.constant dense<0.000000e+00> : vector<8xf32>
    %47 = vector.multi_reduction <add>, %46, %cst_23 [1] : vector<8x8xf32> to vector<8xf32>
    %48 = vector.shape_cast %47 : vector<8xf32> to vector<8x1xf32>
    %49 = vector.broadcast %48 : vector<8x1xf32> to vector<8x8xf32>
    %50 = arith.divf %46, %49 : vector<8x8xf32>
    %cst_24 = arith.constant dense<0.000000e+00> : vector<8x8xf32>
    %51 = tpu.matmul %50, %38, %cst_24 {dimension_numbers = #tpu.dot_dimension_numbers<[1], [0], [0], [1], [0, 0, 1, 1], [], []>} : vector<8x8xf32>, vector<8x8xf32>, vector<8x8xf32> -> vector<8x8xf32>
    %52 = vector.extract_strided_slice %35 {offsets = [0, 8], sizes = [8, 8], strides = [1, 1]} : vector<8x96xf32> to vector<8x8xf32>
    %53 = vector.extract_strided_slice %35 {offsets = [0, 40], sizes = [8, 8], strides = [1, 1]} : vector<8x96xf32> to vector<8x8xf32>
    %54 = vector.extract_strided_slice %35 {offsets = [0, 72], sizes = [8, 8], strides = [1, 1]} : vector<8x96xf32> to vector<8x8xf32>
    %cst_25 = arith.constant dense<0.000000e+00> : vector<8x8xf32>
    %55 = tpu.matmul %52, %53, %cst_25 {dimension_numbers = #tpu.dot_dimension_numbers<[1], [1], [0], [0], [0, 0, 1, 0], [], []>} : vector<8x8xf32>, vector<8x8xf32>, vector<8x8xf32> -> vector<8x8xf32>
    %cst_26 = arith.constant 0.353553385 : f32
    %56 = vector.broadcast %cst_26 : f32 to vector<8x8xf32>
    %57 = arith.mulf %55, %56 : vector<8x8xf32>
    %cst_27 = arith.constant dense<0xFF800000> : vector<8xf32>
    %58 = vector.multi_reduction <maximumf>, %57, %cst_27 [1] : vector<8x8xf32> to vector<8xf32>
    %59 = vector.shape_cast %58 : vector<8xf32> to vector<8x1xf32>
    %60 = vector.broadcast %59 : vector<8x1xf32> to vector<8x8xf32>
    %61 = arith.subf %57, %60 : vector<8x8xf32>
    %62 = math.exp %61 : vector<8x8xf32>
    %cst_28 = arith.constant dense<0.000000e+00> : vector<8xf32>
    %63 = vector.multi_reduction <add>, %62, %cst_28 [1] : vector<8x8xf32> to vector<8xf32>
    %64 = vector.shape_cast %63 : vector<8xf32> to vector<8x1xf32>
    %65 = vector.broadcast %64 : vector<8x1xf32> to vector<8x8xf32>
    %66 = arith.divf %62, %65 : vector<8x8xf32>
    %cst_29 = arith.constant dense<0.000000e+00> : vector<8x8xf32>
    %67 = tpu.matmul %66, %54, %cst_29 {dimension_numbers = #tpu.dot_dimension_numbers<[1], [0], [0], [1], [0, 0, 1, 1], [], []>} : vector<8x8xf32>, vector<8x8xf32>, vector<8x8xf32> -> vector<8x8xf32>
    %68 = vector.extract_strided_slice %35 {offsets = [0, 16], sizes = [8, 8], strides = [1, 1]} : vector<8x96xf32> to vector<8x8xf32>
    %69 = vector.extract_strided_slice %35 {offsets = [0, 48], sizes = [8, 8], strides = [1, 1]} : vector<8x96xf32> to vector<8x8xf32>
    %70 = vector.extract_strided_slice %35 {offsets = [0, 80], sizes = [8, 8], strides = [1, 1]} : vector<8x96xf32> to vector<8x8xf32>
    %cst_30 = arith.constant dense<0.000000e+00> : vector<8x8xf32>
    %71 = tpu.matmul %68, %69, %cst_30 {dimension_numbers = #tpu.dot_dimension_numbers<[1], [1], [0], [0], [0, 0, 1, 0], [], []>} : vector<8x8xf32>, vector<8x8xf32>, vector<8x8xf32> -> vector<8x8xf32>
    %cst_31 = arith.constant 0.353553385 : f32
    %72 = vector.broadcast %cst_31 : f32 to vector<8x8xf32>
    %73 = arith.mulf %71, %72 : vector<8x8xf32>
    %cst_32 = arith.constant dense<0xFF800000> : vector<8xf32>
    %74 = vector.multi_reduction <maximumf>, %73, %cst_32 [1] : vector<8x8xf32> to vector<8xf32>
    %75 = vector.shape_cast %74 : vector<8xf32> to vector<8x1xf32>
    %76 = vector.broadcast %75 : vector<8x1xf32> to vector<8x8xf32>
    %77 = arith.subf %73, %76 : vector<8x8xf32>
    %78 = math.exp %77 : vector<8x8xf32>
    %cst_33 = arith.constant dense<0.000000e+00> : vector<8xf32>
    %79 = vector.multi_reduction <add>, %78, %cst_33 [1] : vector<8x8xf32> to vector<8xf32>
    %80 = vector.shape_cast %79 : vector<8xf32> to vector<8x1xf32>
    %81 = vector.broadcast %80 : vector<8x1xf32> to vector<8x8xf32>
    %82 = arith.divf %78, %81 : vector<8x8xf32>
    %cst_34 = arith.constant dense<0.000000e+00> : vector<8x8xf32>
    %83 = tpu.matmul %82, %70, %cst_34 {dimension_numbers = #tpu.dot_dimension_numbers<[1], [0], [0], [1], [0, 0, 1, 1], [], []>} : vector<8x8xf32>, vector<8x8xf32>, vector<8x8xf32> -> vector<8x8xf32>
    %84 = vector.extract_strided_slice %35 {offsets = [0, 24], sizes = [8, 8], strides = [1, 1]} : vector<8x96xf32> to vector<8x8xf32>
    %85 = vector.extract_strided_slice %35 {offsets = [0, 56], sizes = [8, 8], strides = [1, 1]} : vector<8x96xf32> to vector<8x8xf32>
    %86 = vector.extract_strided_slice %35 {offsets = [0, 88], sizes = [8, 8], strides = [1, 1]} : vector<8x96xf32> to vector<8x8xf32>
    %cst_35 = arith.constant dense<0.000000e+00> : vector<8x8xf32>
    %87 = tpu.matmul %84, %85, %cst_35 {dimension_numbers = #tpu.dot_dimension_numbers<[1], [1], [0], [0], [0, 0, 1, 0], [], []>} : vector<8x8xf32>, vector<8x8xf32>, vector<8x8xf32> -> vector<8x8xf32>
    %cst_36 = arith.constant 0.353553385 : f32
    %88 = vector.broadcast %cst_36 : f32 to vector<8x8xf32>
    %89 = arith.mulf %87, %88 : vector<8x8xf32>
    %cst_37 = arith.constant dense<0xFF800000> : vector<8xf32>
    %90 = vector.multi_reduction <maximumf>, %89, %cst_37 [1] : vector<8x8xf32> to vector<8xf32>
    %91 = vector.shape_cast %90 : vector<8xf32> to vector<8x1xf32>
    %92 = vector.broadcast %91 : vector<8x1xf32> to vector<8x8xf32>
    %93 = arith.subf %89, %92 : vector<8x8xf32>
    %94 = math.exp %93 : vector<8x8xf32>
    %cst_38 = arith.constant dense<0.000000e+00> : vector<8xf32>
    %95 = vector.multi_reduction <add>, %94, %cst_38 [1] : vector<8x8xf32> to vector<8xf32>
    %96 = vector.shape_cast %95 : vector<8xf32> to vector<8x1xf32>
    %97 = vector.broadcast %96 : vector<8x1xf32> to vector<8x8xf32>
    %98 = arith.divf %94, %97 : vector<8x8xf32>
    %cst_39 = arith.constant dense<0.000000e+00> : vector<8x8xf32>
    %99 = tpu.matmul %98, %86, %cst_39 {dimension_numbers = #tpu.dot_dimension_numbers<[1], [0], [0], [1], [0, 0, 1, 1], [], []>} : vector<8x8xf32>, vector<8x8xf32>, vector<8x8xf32> -> vector<8x8xf32>
    %100 = tpu.concatenate %51, %67, %83, %99 in 1 : vector<8x8xf32>, vector<8x8xf32>, vector<8x8xf32>, vector<8x8xf32> -> vector<8x32xf32>
    %c1_i32 = arith.constant 1 : i32
    %101 = arith.cmpi eq, %arg1, %c1_i32 : i32
    %102 = arith.extui %101 : i1 to i32
    %c0_i32_40 = arith.constant 0 : i32
    %103 = arith.cmpi ne, %102, %c0_i32_40 : i32
    scf.if %103 {
      %c0_80 = arith.constant 0 : index
      %c0_81 = arith.constant 0 : index
      %c0_82 = arith.constant 0 : index
      %c0_83 = arith.constant 0 : index
      %167 = vector.load %arg16[%c0_80, %c0_81, %c0_82, %c0_83] : memref<1x4x8x8xf32, #tpu.memory_space<vmem>>, vector<1x1x8x8xf32>
      %168 = vector.shape_cast %167 : vector<1x1x8x8xf32> to vector<8x8xf32>
      %169 = vector.shape_cast %50 : vector<8x8xf32> to vector<1x1x8x8xf32>
      tpu.vector_store %arg16[%c0_80, %c0_81, %c0_82, %c0_83], %169 {strides = array<i32>} : memref<1x4x8x8xf32, #tpu.memory_space<vmem>>, vector<1x1x8x8xf32>,
      %c0_84 = arith.constant 0 : index
      %c1 = arith.constant 1 : index
      %c0_85 = arith.constant 0 : index
      %c0_86 = arith.constant 0 : index
      %170 = vector.load %arg16[%c0_84, %c1, %c0_85, %c0_86] : memref<1x4x8x8xf32, #tpu.memory_space<vmem>>, vector<1x1x8x8xf32>
      %171 = vector.shape_cast %170 : vector<1x1x8x8xf32> to vector<8x8xf32>
      %172 = vector.shape_cast %66 : vector<8x8xf32> to vector<1x1x8x8xf32>
      tpu.vector_store %arg16[%c0_84, %c1, %c0_85, %c0_86], %172 {strides = array<i32>} : memref<1x4x8x8xf32, #tpu.memory_space<vmem>>, vector<1x1x8x8xf32>,
      %c0_87 = arith.constant 0 : index
      %c2 = arith.constant 2 : index
      %c0_88 = arith.constant 0 : index
      %c0_89 = arith.constant 0 : index
      %173 = vector.load %arg16[%c0_87, %c2, %c0_88, %c0_89] : memref<1x4x8x8xf32, #tpu.memory_space<vmem>>, vector<1x1x8x8xf32>
      %174 = vector.shape_cast %173 : vector<1x1x8x8xf32> to vector<8x8xf32>
      %175 = vector.shape_cast %82 : vector<8x8xf32> to vector<1x1x8x8xf32>
      tpu.vector_store %arg16[%c0_87, %c2, %c0_88, %c0_89], %175 {strides = array<i32>} : memref<1x4x8x8xf32, #tpu.memory_space<vmem>>, vector<1x1x8x8xf32>,
      %c0_90 = arith.constant 0 : index
      %c3 = arith.constant 3 : index
      %c0_91 = arith.constant 0 : index
      %c0_92 = arith.constant 0 : index
      %176 = vector.load %arg16[%c0_90, %c3, %c0_91, %c0_92] : memref<1x4x8x8xf32, #tpu.memory_space<vmem>>, vector<1x1x8x8xf32>
      %177 = vector.shape_cast %176 : vector<1x1x8x8xf32> to vector<8x8xf32>
      %178 = vector.shape_cast %98 : vector<8x8xf32> to vector<1x1x8x8xf32>
      tpu.vector_store %arg16[%c0_90, %c3, %c0_91, %c0_92], %178 {strides = array<i32>} : memref<1x4x8x8xf32, #tpu.memory_space<vmem>>, vector<1x1x8x8xf32>,
    } else {
    }
    %c0_41 = arith.constant 0 : index
    %c0_42 = arith.constant 0 : index
    %c0_43 = arith.constant 0 : index
    %104 = vector.load %arg7[%c0_41, %c0_42, %c0_43] : memref<1x32x32xf32, #tpu.memory_space<vmem>>, vector<1x32x32xf32>
    %105 = vector.shape_cast %104 : vector<1x32x32xf32> to vector<32x32xf32>
    %cst_44 = arith.constant dense<0.000000e+00> : vector<8x32xf32>
    %106 = tpu.matmul %100, %105, %cst_44 {dimension_numbers = #tpu.dot_dimension_numbers<[1], [0], [0], [1], [0, 0, 1, 1], [], []>} : vector<8x32xf32>, vector<32x32xf32>, vector<8x32xf32> -> vector<8x32xf32>
    %107 = arith.addf %4, %106 : vector<8x32xf32>
    %c0_45 = arith.constant 0 : index
    %c0_46 = arith.constant 0 : index
    %c0_47 = arith.constant 0 : index
    %108 = vector.load %arg8[%c0_45, %c0_46, %c0_47] : memref<1x1x32xf32, #tpu.memory_space<vmem>>, vector<1x1x32xf32>
    %109 = vector.shape_cast %108 : vector<1x1x32xf32> to vector<1x32xf32>
    %110 = vector.broadcast %109 : vector<1x32xf32> to vector<8x32xf32>
    %111 = arith.addf %107, %110 : vector<8x32xf32>
    %c0_48 = arith.constant 0 : index
    %c0_49 = arith.constant 0 : index
    %c0_50 = arith.constant 0 : index
    %112 = vector.load %arg9[%c0_48, %c0_49, %c0_50] : memref<1x1x32xf32, #tpu.memory_space<vmem>>, vector<1x1x32xf32>
    %113 = vector.shape_cast %112 : vector<1x1x32xf32> to vector<1x32xf32>
    %c0_51 = arith.constant 0 : index
    %c0_52 = arith.constant 0 : index
    %c0_53 = arith.constant 0 : index
    %114 = vector.load %arg10[%c0_51, %c0_52, %c0_53] : memref<1x1x32xf32, #tpu.memory_space<vmem>>, vector<1x1x32xf32>
    %115 = vector.shape_cast %114 : vector<1x1x32xf32> to vector<1x32xf32>
    %cst_54 = arith.constant dense<0.000000e+00> : vector<8xf32>
    %116 = vector.multi_reduction <add>, %111, %cst_54 [1] : vector<8x32xf32> to vector<8xf32>
    %117 = vector.shape_cast %116 : vector<8xf32> to vector<8x1xf32>
    %cst_55 = arith.constant 3.200000e+01 : f32
    %118 = vector.broadcast %cst_55 : f32 to vector<8x1xf32>
    %119 = arith.divf %117, %118 : vector<8x1xf32>
    %120 = vector.broadcast %119 : vector<8x1xf32> to vector<8x32xf32>
    %121 = arith.subf %111, %120 : vector<8x32xf32>
    %122 = arith.mulf %121, %121 : vector<8x32xf32>
    %cst_56 = arith.constant dense<0.000000e+00> : vector<8xf32>
    %123 = vector.multi_reduction <add>, %122, %cst_56 [1] : vector<8x32xf32> to vector<8xf32>
    %124 = vector.shape_cast %123 : vector<8xf32> to vector<8x1xf32>
    %cst_57 = arith.constant 3.200000e+01 : f32
    %125 = vector.broadcast %cst_57 : f32 to vector<8x1xf32>
    %126 = arith.divf %124, %125 : vector<8x1xf32>
    %cst_58 = arith.constant 9.99999974E-6 : f32
    %127 = vector.broadcast %cst_58 : f32 to vector<8x1xf32>
    %128 = arith.addf %126, %127 : vector<8x1xf32>
    %129 = math.rsqrt %128 : vector<8x1xf32>
    %130 = vector.broadcast %129 : vector<8x1xf32> to vector<8x32xf32>
    %131 = arith.mulf %121, %130 : vector<8x32xf32>
    %132 = vector.broadcast %113 : vector<1x32xf32> to vector<8x32xf32>
    %133 = arith.mulf %131, %132 : vector<8x32xf32>
    %134 = vector.broadcast %115 : vector<1x32xf32> to vector<8x32xf32>
    %135 = arith.addf %133, %134 : vector<8x32xf32>
    %c0_59 = arith.constant 0 : index
    %c0_60 = arith.constant 0 : index
    %c0_61 = arith.constant 0 : index
    %136 = vector.load %arg11[%c0_59, %c0_60, %c0_61] : memref<1x32x64xf32, #tpu.memory_space<vmem>>, vector<1x32x64xf32>
    %137 = vector.shape_cast %136 : vector<1x32x64xf32> to vector<32x64xf32>
    %cst_62 = arith.constant dense<0.000000e+00> : vector<8x64xf32>
    %138 = tpu.matmul %135, %137, %cst_62 {dimension_numbers = #tpu.dot_dimension_numbers<[1], [0], [0], [1], [0, 0, 1, 1], [], []>} : vector<8x32xf32>, vector<32x64xf32>, vector<8x64xf32> -> vector<8x64xf32>
    %c0_63 = arith.constant 0 : index
    %c0_64 = arith.constant 0 : index
    %c0_65 = arith.constant 0 : index
    %139 = vector.load %arg12[%c0_63, %c0_64, %c0_65] : memref<1x1x64xf32, #tpu.memory_space<vmem>>, vector<1x1x64xf32>
    %140 = vector.shape_cast %139 : vector<1x1x64xf32> to vector<1x64xf32>
    %141 = vector.broadcast %140 : vector<1x64xf32> to vector<8x64xf32>
    %142 = arith.addf %138, %141 : vector<8x64xf32>
    %cst_66 = arith.constant 5.000000e-01 : f32
    %143 = vector.broadcast %cst_66 : f32 to vector<8x64xf32>
    %144 = arith.mulf %143, %142 : vector<8x64xf32>
    %cst_67 = arith.constant 4.471500e-02 : f32
    %145 = vector.broadcast %cst_67 : f32 to vector<8x64xf32>
    %146 = arith.mulf %145, %142 : vector<8x64xf32>
    %147 = arith.mulf %146, %142 : vector<8x64xf32>
    %148 = arith.mulf %147, %142 : vector<8x64xf32>
    %149 = arith.addf %142, %148 : vector<8x64xf32>
    %cst_68 = arith.constant 0.797884583 : f32
    %150 = vector.broadcast %cst_68 : f32 to vector<8x64xf32>
    %151 = arith.mulf %150, %149 : vector<8x64xf32>
    %152 = math.tanh %151 : vector<8x64xf32>
    %cst_69 = arith.constant 1.000000e+00 : f32
    %153 = vector.broadcast %cst_69 : f32 to vector<8x64xf32>
    %154 = arith.addf %153, %152 : vector<8x64xf32>
    %155 = arith.mulf %144, %154 : vector<8x64xf32>
    %c0_70 = arith.constant 0 : index
    %c0_71 = arith.constant 0 : index
    %c0_72 = arith.constant 0 : index
    %156 = vector.load %arg13[%c0_70, %c0_71, %c0_72] : memref<1x64x32xf32, #tpu.memory_space<vmem>>, vector<1x64x32xf32>
    %157 = vector.shape_cast %156 : vector<1x64x32xf32> to vector<64x32xf32>
    %cst_73 = arith.constant dense<0.000000e+00> : vector<8x32xf32>
    %158 = tpu.matmul %155, %157, %cst_73 {dimension_numbers = #tpu.dot_dimension_numbers<[1], [0], [0], [1], [0, 0, 1, 1], [], []>} : vector<8x64xf32>, vector<64x32xf32>, vector<8x32xf32> -> vector<8x32xf32>
    %159 = arith.addf %111, %158 : vector<8x32xf32>
    %c0_74 = arith.constant 0 : index
    %c0_75 = arith.constant 0 : index
    %c0_76 = arith.constant 0 : index
    %160 = vector.load %arg14[%c0_74, %c0_75, %c0_76] : memref<1x1x32xf32, #tpu.memory_space<vmem>>, vector<1x1x32xf32>
    %161 = vector.shape_cast %160 : vector<1x1x32xf32> to vector<1x32xf32>
    %162 = vector.broadcast %161 : vector<1x32xf32> to vector<8x32xf32>
    %163 = arith.addf %159, %162 : vector<8x32xf32>
    %c0_77 = arith.constant 0 : index
    %c0_78 = arith.constant 0 : index
    %c0_79 = arith.constant 0 : index
    %164 = vector.load %arg15[%c0_77, %c0_78, %c0_79] : memref<1x8x32xf32, #tpu.memory_space<vmem>>, vector<1x8x32xf32>
    %165 = vector.shape_cast %164 : vector<1x8x32xf32> to vector<8x32xf32>
    %166 = vector.shape_cast %163 : vector<8x32xf32> to vector<1x8x32xf32>
    tpu.vector_store %arg15[%c0_77, %c0_78, %c0_79], %166 {strides = array<i32>} : memref<1x8x32xf32, #tpu.memory_space<vmem>>, vector<1x8x32xf32>,
    return
  }
  func.func @transform_0(%arg0: i32, %arg1: i32) -> (i32, i32, i32) {
    %c0_i32 = arith.constant 0 : i32
    %c0_i32_0 = arith.constant 0 : i32
    %c0_i32_1 = arith.constant 0 : i32
    return %arg0, %c0_i32, %c0_i32_0 : i32, i32, i32
  }
  func.func @transform_1(%arg0: i32, %arg1: i32) -> (i32, i32, i32) {
    %c0_i32 = arith.constant 0 : i32
    %c0_i32_0 = arith.constant 0 : i32
    %c0_i32_1 = arith.constant 0 : i32
    return %arg1, %c0_i32, %c0_i32_0 : i32, i32, i32
  }
  func.func @transform_2(%arg0: i32, %arg1: i32) -> (i32, i32, i32) {
    %c0_i32 = arith.constant 0 : i32
    %c0_i32_0 = arith.constant 0 : i32
    %c0_i32_1 = arith.constant 0 : i32
    return %arg1, %c0_i32, %c0_i32_0 : i32, i32, i32
  }
  func.func @transform_3(%arg0: i32, %arg1: i32) -> (i32, i32, i32) {
    %c0_i32 = arith.constant 0 : i32
    %c0_i32_0 = arith.constant 0 : i32
    %c0_i32_1 = arith.constant 0 : i32
    return %arg1, %c0_i32, %c0_i32_0 : i32, i32, i32
  }
  func.func @transform_4(%arg0: i32, %arg1: i32) -> (i32, i32, i32) {
    %c0_i32 = arith.constant 0 : i32
    %c0_i32_0 = arith.constant 0 : i32
    %c0_i32_1 = arith.constant 0 : i32
    return %arg1, %c0_i32, %c0_i32_0 : i32, i32, i32
  }
  func.func @transform_5(%arg0: i32, %arg1: i32) -> (i32, i32, i32) {
    %c0_i32 = arith.constant 0 : i32
    %c0_i32_0 = arith.constant 0 : i32
    %c0_i32_1 = arith.constant 0 : i32
    return %arg1, %c0_i32, %c0_i32_0 : i32, i32, i32
  }
  func.func @transform_6(%arg0: i32, %arg1: i32) -> (i32, i32, i32) {
    %c0_i32 = arith.constant 0 : i32
    %c0_i32_0 = arith.constant 0 : i32
    %c0_i32_1 = arith.constant 0 : i32
    return %arg1, %c0_i32, %c0_i32_0 : i32, i32, i32
  }
  func.func @transform_7(%arg0: i32, %arg1: i32) -> (i32, i32, i32) {
    %c0_i32 = arith.constant 0 : i32
    %c0_i32_0 = arith.constant 0 : i32
    %c0_i32_1 = arith.constant 0 : i32
    return %arg1, %c0_i32, %c0_i32_0 : i32, i32, i32
  }
  func.func @transform_8(%arg0: i32, %arg1: i32) -> (i32, i32, i32) {
    %c0_i32 = arith.constant 0 : i32
    %c0_i32_0 = arith.constant 0 : i32
    %c0_i32_1 = arith.constant 0 : i32
    return %arg1, %c0_i32, %c0_i32_0 : i32, i32, i32
  }
  func.func @transform_9(%arg0: i32, %arg1: i32) -> (i32, i32, i32) {
    %c0_i32 = arith.constant 0 : i32
    %c0_i32_0 = arith.constant 0 : i32
    %c0_i32_1 = arith.constant 0 : i32
    return %arg1, %c0_i32, %c0_i32_0 : i32, i32, i32
  }
  func.func @transform_10(%arg0: i32, %arg1: i32) -> (i32, i32, i32) {
    %c0_i32 = arith.constant 0 : i32
    %c0_i32_0 = arith.constant 0 : i32
    %c0_i32_1 = arith.constant 0 : i32
    return %arg1, %c0_i32, %c0_i32_0 : i32, i32, i32
  }
  func.func @transform_11(%arg0: i32, %arg1: i32) -> (i32, i32, i32) {
    %c0_i32 = arith.constant 0 : i32
    %c0_i32_0 = arith.constant 0 : i32
    %c0_i32_1 = arith.constant 0 : i32
    return %arg1, %c0_i32, %c0_i32_0 : i32, i32, i32
  }
  func.func @transform_12(%arg0: i32, %arg1: i32) -> (i32, i32, i32) {
    %c0_i32 = arith.constant 0 : i32
    %c0_i32_0 = arith.constant 0 : i32
    %c0_i32_1 = arith.constant 0 : i32
    return %arg1, %c0_i32, %c0_i32_0 : i32, i32, i32
  }
  func.func @transform_13(%arg0: i32, %arg1: i32) -> (i32, i32, i32) {
    %c0_i32 = arith.constant 0 : i32
    %c0_i32_0 = arith.constant 0 : i32
    %c0_i32_1 = arith.constant 0 : i32
    return %arg0, %c0_i32, %c0_i32_0 : i32, i32, i32
  }
  func.func @transform_14(%arg0: i32, %arg1: i32) -> (i32, i32, i32, i32) {
    %c0_i32 = arith.constant 0 : i32
    %c0_i32_0 = arith.constant 0 : i32
    %c0_i32_1 = arith.constant 0 : i32
    %c0_i32_2 = arith.constant 0 : i32
    return %arg0, %c0_i32, %c0_i32_0, %c0_i32_1 : i32, i32, i32, i32
  }
}

</mosaic_0001>

<bundles_post_ra>
// kernel: tpu_custom_call.1
= control target key start
LH: loop header
LB: loop body
LE: loop exit
PB: predicated region body
PF: predicated region fallthrough
CT: control target
= control target key end

     0   :  { %s3265_s0 = inlined_call_operand.hbm [shape: f32[2,8,32], index: 0, kind: input, shape index: {}]   ;;  %s3266_s1 = inlined_call_operand.hbm [shape: f32[2,1,32], index: 1, kind: input, shape index: {}]   ;;  %s3267_s2 = inlined_call_operand.vmem [shape: f32[2,1,32], index: 2, kind: input, shape index: {}]   ;;  %s3268_s3 = inlined_call_operand.vmem [shape: f32[2,32,96], index: 3, kind: input, shape index: {}]   ;;  %s3269_s4 = inlined_call_operand.vmem [shape: f32[2,1,96], index: 4, kind: input, shape index: {}]   ;;  %s3270_s5 = inlined_call_operand.vmem [shape: f32[2,32,32], index: 5, kind: input, shape index: {}]   ;;  %s3271_s6 = inlined_call_operand.vmem [shape: f32[2,1,32], index: 6, kind: input, shape index: {}]   ;;  %s3272_s7 = inlined_call_operand.vmem [shape: f32[2,1,32], index: 7, kind: input, shape index: {}]   ;;  %s3273_s8 = inlined_call_operand.vmem [shape: f32[2,1,32], index: 8, kind: input, shape index: {}]   ;;  %s3274_s9 = inlined_call_operand.vmem [shape: f32[2,32,64], index: 9, kind: input, shape index: {}]   ;;  %s3275_s10 = inlined_call_operand.vmem [shape: f32[2,1,64], index: 10, kind: input, shape index: {}]   ;;  %s3276_s11 = inlined_call_operand.vmem [shape: f32[2,64,32], index: 11, kind: input, shape index: {}]   ;;  %s3277_s12 = inlined_call_operand.vmem [shape: f32[2,1,32], index: 12, kind: input, shape index: {}]   ;;  %s3278_s13 = inlined_call_operand.hbm [shape: f32[2,8,32], index: 13, kind: output, shape index: {0}]   ;;  %s3279_s14 = inlined_call_operand.hbm [shape: f32[2,4,8,8], index: 14, kind: output, shape index: {1}]  }
   0x1   :  { %3303 = sst [smem:[#allocation31_spill]] %s3265_s0 }
   0x2   :  { %3304 = sst [smem:[#allocation32_spill]] %s3266_s1 }
   0x3   :  { %3305 = sst [smem:[#allocation33_spill]] %s3268_s3 }
   0x4   :  { %3306 = sst [smem:[#allocation34_spill]] %s3270_s5 }
   0x5   :  { %3307 = sst [smem:[#allocation35_spill]] %s3271_s6 }
   0x6   :  { %3308 = sst [smem:[#allocation36_spill]] %s3272_s7 }
   0x7   :  { %3309 = sst [smem:[#allocation37_spill]] %s3273_s8 }
   0x8   :  { %3310 = sst [smem:[#allocation38_spill]] %s3274_s9 }
   0x9   :  { %3311 = sst [smem:[#allocation39_spill]] %s3275_s10 }
   0xa   :  { %3312 = sst [smem:[#allocation40_spill]] %s3276_s11 }
   0xb   :  { %3313 = sst [smem:[#allocation41_spill]] %s3277_s12 }
   0xc   :  { %3314 = sst [smem:[#allocation42_spill]] %s3278_s13 }
   0xd   :  { %3315 = sst [smem:[#allocation43_spill]] %s3279_s14 }
   0xe   :  { %20 = vsyncpa [#allocation3], 0 }
   0xf   :  { %22 = vsyncpa [#allocation3 + $0x1], 0 }
  0x10   :  { %23 = vsyncpa [#allocation6], 0 }
  0x11   :  { %25 = vsyncpa [#allocation6 + $0x1], 0 }
  0x12   :  { %26 = vsyncpa [#allocation4], 0 }
  0x13   :  { %28 = vsyncpa [#allocation4 + $0x1], 0 }
  0x14   :  { %29 = vsyncpa [#allocation9], 0 }
  0x15   :  { %31 = vsyncpa [#allocation9 + $0x1], 0  ;;  %s2763_s29 = smov 0   ;;  %s2765_s30 = smov 0  }
  0x16   :  { %s2767_s15 = smov 0   ;;  %s2769_s16 = smov 0  }
  0x17   :  { %s2771_s17 = smov 0   ;;  %s2773_s18 = smov 0  }
  0x18   :  { %s2775_s19 = smov 0   ;;  %s2777_s20 = smov 0  }
  0x19   :  { %s2779_s21 = smov 0   ;;  %s2781_s22 = smov 0  }
  0x1a   :  { %s2783_s23 = smov 0  }
  0x1b LB: > { %3316 = sst [smem:[#allocation14_spill]] %s2629_s30  ;;  %s2112_s24 = sadd.s32 4294967295, %s2665_s23   ;;  %s2665_s23 = sphi %s2783_s23, %s37_s23   ;;  %s2661_s22 = sphi %s2781_s22, %s3387_s22   ;;  %s2657_s21 = sphi %s2779_s21, %s3386_s21   ;;  %s2653_s20 = sphi %s2777_s20, %s3385_s20   ;;  %s2649_s19 = sphi %s2775_s19, %s3384_s19   ;;  %s2645_s18 = sphi %s2773_s18, %s3383_s18   ;;  %s2641_s17 = sphi %s2771_s17, %s3382_s17   ;;  %s2637_s16 = sphi %s2769_s16, %s3381_s16   ;;  %s2633_s15 = sphi %s2767_s15, %s3380_s15   ;;  %s2629_s30 = sphi %s2765_s30, %s3379_s30   ;;  %s2625_s29 = sphi %s2763_s29, %s3378_s29  }
  0x1c   : > { %3317 = sst [smem:[#allocation15_spill]] %s2633_s15  ;;  %s2113_s25 = sadd.s32 4294967294, %s2665_s23  }
  0x1d   : > { %3318 = sst [smem:[#allocation16_spill]] %s2637_s16  ;;  %p63_p0 = scmp.ne.s32.totalorder %s2645_s18, %s2641_s17 }
  0x1e   : > { %3319 = sst [smem:[#allocation17_spill]] %s2641_s17  ;;  %p3287_p1 = scmp.eq.s32.totalorder %s2665_s23, 0 }
  0x1f   : > { %3320 = sst [smem:[#allocation18_spill]] %s2645_s18  ;;  %p69_p2 = scmp.ne.s32.totalorder %s2641_s17, %s2637_s16 }
  0x20   : > { %3321 = sst [smem:[#allocation19_spill]] %s2653_s20  ;;  %p2826_p3 = scmp.eq.s32.totalorder %s2112_s24, 0 }
  0x21   : > { %3322 = sst [smem:[#allocation20_spill]] %s2657_s21  ;;  %p2832_p4 = por %p3287_p1, %p63_p0 }
  0x22   : > { %3323 = sst [smem:[#allocation21_spill]] %s2661_s22  ;;  %p405_p5 = scmp.eq.s32.totalorder %s2112_s24, 3 }
  0x23   : > { %3324 = sst [smem:[#allocation22_spill]] %s2665_s23  ;;  %p2838_p6 = por %p2826_p3, %p69_p2 }
  0x24   : > { %p411_p7 = scmp.eq.s32.totalorder %s2113_s25, 3  ;;  %p2842_p8 = por %p405_p5, %p63_p0 }
  0x25   : > { %p3288_p10 = scmp.lt.s32.totalorder %s2665_s23, 4  ;;  %s457_s14 = sand.u32 1, %s2645_s18  }
  0x26   : > { %s3328_s16 = scalar_select %p2842_p8, 1, 0 }
  0x27   : > { %p2846_p9 = por %p411_p7, %p69_p2  ;;  %s2117_s20 = sshll.u32 %s2661_s22, 7 }
  0x28   : > { %3329 = sst [smem:[#allocation23_spill]] %s3328_s16  ;;  %s2116_s11 = sshll.u32 %s457_s14, 3 }
  0x29   : > { %s3330_s13 = scalar_select %p2846_p9, 1, 0 }
  0x2a   : > { %s3332_s0 = sld [smem:[#allocation31_spill]]  ;;  %s461_s9 = scalar_lea.vmem [#allocation2], %s2116_s11 }
  0x2b   : > { %3331 = sst [smem:[#allocation24_spill]] %s3330_s13  ;;  %s468_s8 = sshll.u32 %s461_s9, 4  ;;  %s469_s8 = int_to_ptr.vmem [resolvable:$true] %s468_s8 }
  0x2c   : > { %p2860_p11 = pnand %p3288_p10, %p2832_p4  ;;  %p2119_p12 = scmp.ge.s32.totalorder %s2665_s23, 1 }
  0x2d   : > { %p564_p13 = scmp.lt.s32.totalorder %s2665_s23, 5  ;;  %s458_s13 = scalar_lea.sflag [#allocation3], %s457_s14 }
  0x2e   : > { %p2457_p0 = pneg %p2860_p11  ;;  %s2468_s16 = scalar_lea.vmem %s469_s8, 128 }
  0x2f   : > { %p2469_p2 = scmp.ne.s32.totalorder %s469_s8, %s2468_s16  ;;  %s2667_s12 = smov [#allocation2]  }
  0x30   : > { %s466_s10 = scalar_lea.hbm %s3332_s0, %s2117_s20  ;;  %s2473_s11 = sshll.u32 %s2667_s12, 4  ;;  %s2474_s11 = int_to_ptr.vmem [resolvable:$false] %s2473_s11 }
  0x31   : > { %p2471_p5 = pnand %p2469_p2, %p2457_p0  ;;  %s2475_s9 = scalar_lea.vmem %s2474_s11, 256 }
  0x32   : > { %p2476_p1 = scmp.lt.s32.totalorder %s469_s8, %s2474_s11  ;;  %p2477_p4 = scmp.lt.s32.totalorder %s2475_s9, %s2468_s16 }
  0x33   : > { %p2472_p7 = pneg %p2471_p5 }
  0x34   : > { %p2478_p10 = por %p2477_p4, %p2476_p1 }
  0x36   : > { %p2479_p9 = pnand %p2478_p10, %p2472_p7 }
  0x38   : > { %2482 = shalt.err (!%p2479_p9)
}
  0x39   : > { %2315 = dma.hbm_to_vmem [thread:$0]  (!%p2860_p11), %s466_s10, 128, %s469_s8, %s458_s13  }
  0x3a   : > { %s56_s14 = sadd.s32 1, %s2645_s18  ;;  %p2875_p1 = pnand %p2119_p12, %p564_p13 }
  0x3b   : > { %s46_s20 = sadd.s32 1, %s2657_s21  ;;  %s82_s28 = sadd.s32 1, %s2633_s15 }
  0x3c   : > { %p47_p9 = scmp.ge.s32.totalorder %s46_s20, 2  ;;  %p95_p10 = scmp.ne.s32.totalorder %s2629_s30, %s2625_s29 }
  0x3d   : > { %s3336_s24 = sadd.s32 1, %s2661_s22  ;;  %p89_p11 = scmp.ne.s32.totalorder %s2633_s15, %s2629_s30 }
  0x3e   : > { %s3389_s20 = smov (%p47_p9, %s46_s20), 0  ;;  %s3391_s24 = smov (!%p47_p9, %s3336_s24), %s2661_s22 }
  0x3f   : > { %3335 = sst [smem:[#allocation25_spill]] %s3389_s20  ;;  %s79_s8 = ssub.s32 %s2657_s21, %s3389_s20 }
  0x40   : > { %p51_p0 = scmp.ge.s32.totalorder %s3391_s24, 2  ;;  %p80_p12 = scmp.eq.s32.totalorder %s79_s8, 0 }
  0x41   : > { %p2894_p13 = por %p95_p10, %p2826_p3  ;;  %s475_s13 = sand.u32 1, %s2633_s15  }
  0x42   : > { %s3393_s24 = smov (%p51_p0, %s3391_s24), 0  ;;  %p3340_p2 = scmp.eq.s32.totalorder %s2665_s23, 0 }
  0x43   : > { %3338 = sst [smem:[#allocation26_spill]] %s3393_s24  ;;  %s53_s25 = ssub.s32 %s2661_s22, %s3393_s24 }
  0x44   : > { %s2902_s29 = scalar_select %p80_p12, %s2633_s15, %s82_s28  }
  0x45   : > { %p91_p5 = por %p89_p11, %p3340_p2  ;;  %p54_p7 = scmp.eq.s32.totalorder %s53_s25, 0 }
  0x46   : > { %3339 = sst [smem:[#allocation27_spill]] %s2902_s29  ;;  %s2118_s12 = sshll.u32 %s2657_s21, 4 }
  0x47   : > { %s478_s11 = scalar_lea.vmem [#allocation5], %s475_s13  ;;  %s3342_s1 = sld [smem:[#allocation32_spill]] }
  0x48   : > { %s485_s9 = sshll.u32 %s478_s11, 4  ;;  %p3343_p3 = scmp.lt.s32.totalorder %s2665_s23, 4  ;;  %s486_s9 = int_to_ptr.vmem [resolvable:$true] %s485_s9 }
  0x49   : > { %s2910_s0 = scalar_select %p54_p7, %s2645_s18, %s56_s14  }
  0x4a   : > { %p2917_p4 = pnand %p3343_p3, %p91_p5  ;;  %s476_s28 = scalar_lea.sflag [#allocation6], %s475_s13 }
  0x4b   : > { %3341 = sst [smem:[#allocation28_spill]] %s2910_s0  ;;  %s2496_s25 = scalar_lea.vmem %s486_s9, 16 }
  0x4c   : > { %p2485_p9 = pneg %p2917_p4  ;;  %p2497_p10 = scmp.ne.s32.totalorder %s486_s9, %s2496_s25 }
  0x4d   : > { %s483_s20 = scalar_lea.hbm %s3342_s1, %s2118_s12  ;;  %s2668_s14 = smov [#allocation5]  }
  0x4e   : > { %p2499_p11 = pnand %p2497_p10, %p2485_p9  ;;  %s2501_s11 = sshll.u32 %s2668_s14, 4  ;;  %s2502_s11 = int_to_ptr.vmem [resolvable:$false] %s2501_s11 }
  0x4f   : > { %s2503_s24 = scalar_lea.vmem %s2502_s11, 32  ;;  %p2504_p12 = scmp.lt.s32.totalorder %s486_s9, %s2502_s11 }
  0x50   : > { %p2500_p0 = pneg %p2499_p11  ;;  %p2505_p2 = scmp.lt.s32.totalorder %s2503_s24, %s2496_s25 }
  0x52   : > { %p2506_p7 = por %p2505_p2, %p2504_p12 }
  0x54   : > { %p2507_p8 = pnand %p2506_p7, %p2500_p0 }
  0x56   : > { %2510 = shalt.err (!%p2507_p8)
}
  0x57   : > { %2318 = dma.hbm_to_vmem [thread:$0]  (!%p2917_p4), %s483_s20, 16, %s486_s9, %s476_s28  }
  0x58   : > { %568 = sbr.rel (%p2875_p1) target bundleno = 2534 (0x9e6), region = 72 }
  0x5d   : > { %s2928_s13 = sand.u32 1, %s2641_s17  }
  0x5e   : > { %3345 = sst [smem:[#allocation29_spill]] %s2928_s13  ;;  %s2120_s12 = sshll.u32 %s2928_s13, 3 }
  0x5f   : > { %s571_s27 = scalar_lea.sflag [#allocation3], %s2928_s13  ;;  %s574_s8 = scalar_lea.vmem [#allocation2], %s2120_s12 }
  0x60   : > { %2608 = dma.done.wait (%p2838_p6), %s571_s27, 128  }
  0x61   : > { %2610 = vsyncadd (%p2838_p6), %s571_s27, 4294967168  ;;  %s579_s7 = sand.u32 1, %s2629_s30  }
  0x62   : > { %s580_s20 = scalar_lea.sflag [#allocation6], %s579_s7  ;;  %s2937_s16 = scalar_lea.vmem [#allocation5], %s579_s7 }
  0x63   : > { %2612 = dma.done.wait (%p2894_p13), %s580_s20, 16  }
  0x64   : > { %2614 = vsyncadd (%p2894_p13), %s580_s20, 4294967280  ;;  %s2122_s24 = sshll.u32 %s2928_s13, 5  ;;  %p677_p8 = scmp.lt.s32.totalorder %s2649_s19, 1 }
  0x65   : > { %s3346_s3 = sld [smem:[#allocation33_spill]]  ;;  %s3000_s14 = scalar_lea.vmem [#allocation8], %s2122_s24 }
  0x66   : > { %s2946_s9 = scalar_select %p677_p8, %s2649_s19, 1 }
  0x67   : > { %s3347_s5 = sld [smem:[#allocation34_spill]]  ;;  %p2131_p6 = scmp.ne.s32.totalorder %s2649_s19, 0 }
  0x68   : > { %s2167_s25 = sshll.u32 %s2946_s9, 5  ;;  %s3352_s20 = sld [smem:[#allocation38_spill]] }
  0x69   : > { %s3354_s18 = sld [smem:[#allocation41_spill]] }
  0x6a   : > { %s3355_s10 = sld [smem:[#allocation40_spill]] }
  0x6b   : > { %s2956_s27 = scalar_lea.vmem %s3346_s3, %s2167_s25  ;;  %s3351_s3 = sld [smem:[#allocation37_spill]] }
  0x6d   : > { %s2965_s22 = scalar_lea.vmem %s3347_s5, %s2167_s25  ;;  %s3353_s5 = sld [smem:[#allocation39_spill]] }
  0x6e   : > { %3348 = sst [smem:[#allocation30_spill]] %s2965_s22  ;;  %s2982_s1 = scalar_lea.vmem %s3352_s20, %s2167_s25 }
  0x6f   : > { %s2170_s22 = sshll.u32 %s2946_s9, 6  ;;  %s717_s6 = scalar_lea.vmem %s3354_s18, %s2946_s9 }
  0x70   : > { %s2996_s15 = scalar_lea.vmem %s3355_s10, %s2170_s22  ;;  %721 = sbr.rel (%p2131_p6) target bundleno = 119 (0x77), region = 84 }
  0x71   : > { %s701_s30 = scalar_lea.vmem %s3351_s3, %s2946_s9  ;;  %s2998_s3 = scalar_lea.vmem [#allocation7], %s2120_s12 }
  0x73   : > { %s709_s13 = scalar_lea.vmem %s3353_s5, %s2946_s9 }
  0x75   : > { %v722_v0 = vld [vmem:[%s574_s8] sm:$0xff]  ;;  %vm723_vm0 = vcmask 261120  }
  0x76   : > { %724 = vst.msk [vmem:[%s2998_s3] sm:$0xff] %vm723_vm0, %v722_v0 }
  0x77 PF: > { %vm728_vm1 = vcmask 261120   ;;  %v760_v8 = vld [vmem:[%s2956_s27 + $0x18] sm:$0xff]  ;;  %v2669_v9 = vmov 0.0   ;;  %v759_v10 = vld [vmem:[%s2956_s27 + $0x10] sm:$0xff]  ;;  %vm2670_vm2 = vmmov 0   ;;  %v758_v11 = vld [vmem:[%s2956_s27 + $0x8] sm:$0xff]  ;;  %s3356_s22 = scalar_lea.vmem %s3267_s2, %s2946_s9  ;;  %s3357_s8 = scalar_lea.vmem %s3269_s4, %s2946_s9 }
  0x78   : > { %2212 = vmatprep.subr.mxu1 %v2669_v9  ;;  %2220 = vmatprep.mubr.msk.f32.mxu1 %vm2670_vm2, %v2669_v9  ;;  %v757_v12 = vld [vmem:[%s2956_s27] sm:$0xff]  ;;  %s2672_s24 = smov 96   ;;  %s2673_s25 = smov 88   ;;  %vm844_vm3 = vcmask 64512   ;;  %vm1518_vm4 = vcmask 130048   ;;  %vm1520_vm5 = vcmask 195584  }
  0x79   : > { %2213 = vmatpush3.msra.mxu1 %v760_v8  ;;  %2233 = vmatprep.subr.mxu0 %v2669_v9  ;;  %v2132_v17 = vld [vmem:[%s2937_s16] ss:$0 sm:$0xff]  ;;  %s2671_s16 = smov 120   ;;  %s2674_s27 = smov 80  }
  0x7a   : > { %2214 = vmatprep.subr.mxu1 %v2669_v9  ;;  %2235 = vmatprep.mubr.msk.f32.mxu0 %vm2670_vm2, %v2669_v9  ;;  %v2133_v19 = vld [vmem:[%s3356_s22] ss:$0 sm:$0xff]  ;;  %s2675_s11 = smov 112   ;;  %s2676_s7 = smov 72  }
  0x7b   : > { %2215 = vmatpush3.msra.mxu1 %v759_v10  ;;  %v2134_v22 = vld [vmem:[%s3357_s8] ss:$0 sm:$0xff]  ;;  %s2677_s20 = smov 104   ;;  %s2678_s26 = smov 64  }
  0x7c   : > { %2216 = vmatprep.subr.mxu1 %v2669_v9  ;;  %s2679_s28 = smov 48   ;;  %s2680_s0 = smov 40  }
  0x7d   : > { %v3005_v1 = vld [vmem:[%s2998_s3] sm:$0xff]  ;;  %2217 = vmatpush3.msra.mxu1 %v758_v11  ;;  %s2681_s21 = smov 56   ;;  %s2682_s17 = smov 8  }
  0x7e   : > { %v729_v2 = vsel %vm728_vm1, %v3005_v1, 0.0  ;;  %2218 = vmatprep.subr.mxu1 %v2669_v9  ;;  %s2683_s29 = smov 16   ;;  %s2684_s10 = smov 24  }
  0x7f   : > { %730 = vadd.xlane.f32.xlu0 %v729_v2  ;;  %2219 = vmatpush3.msra.mxu1 %v757_v12  ;;  %p2148_p1 = scmp.ne.s32.totalorder %s2649_s19, 1 }
  0x80   : > { %2223 = vmatprep.subr.mxu1 %v2669_v9 }
 0x108   : > { %v731_v3 = vpop.xlane.xlu0 %730 }
 0x109   : > { %v733_v4 = vmul.f32 0.03125, %v731_v3 }
 0x10b   : > { %v734_v5 = vsub.f32 %v3005_v1, %v733_v4 }
 0x10d   : > { %v735_v6 = vmul.f32 %v734_v5, %v734_v5 }
 0x10f   : > { %v736_v7 = vsel %vm728_vm1, %v735_v6, 0.0 }
 0x110   : > { %737 = vadd.xlane.f32.xlu0 %v736_v7 }
 0x199   : > { %v738_v13 = vpop.xlane.xlu0 %737 }
 0x19a   : > { %v739_v14 = vmul.f32 0.03125, %v738_v13 }
 0x19c   : > { %v740_v15 = vadd.f32 1e-05, %v739_v14 }
 0x19e   : > { %2433 = vrsqrt.f32 %v740_v15 }
 0x1ab   : > { %v2434_v16 = vpop.eup %2433 }
 0x1ac   : > { %v742_v18 = vmul.f32 %v2434_v16, %v734_v5 }
 0x1ae   : > { %v749_v20 = vmul.f32 %v2132_v17, %v742_v18 }
 0x1b0   : > { %v756_v21 = vadd.f32 %v2133_v19, %v749_v20 }
 0x1b2   : > { %2221 = vmatmul.mubr.msk.f32.vlgmr.msra.gmra.mxu1 %vm728_vm1, %v756_v21 }
 0x1b3   : > { %2225 = vmatprep.mubr.msk.f32.mxu1 %vm2670_vm2, %v2669_v9 }
 0x272   : > { %v837_v23 = vpop.f32.mrf.mxu1 }
 0x273   : > { %v3039_v24 = vadd.f32 %v2134_v22, %v837_v23 }
 0x274   : > { %v2222_v25 = vpop.f32.mrf.mxu1 }
 0x275   : > { %1007 = vrot.lane.b32.xlu0 %v3039_v24, %s2671_s16  ;;  %842 = vrot.lane.b32.xlu1 %v3039_v24, %s2672_s24 }
 0x279   : > { %1009 = vrot.lane.b32.xlu1 %v3039_v24, %s2673_s25 }
 0x27d   : > { %1175 = vrot.lane.b32.xlu1 %v3039_v24, %s2674_s27 }
 0x281   : > { %1173 = vrot.lane.b32.xlu1 %v3039_v24, %s2675_s11 }
 0x285   : > { %1341 = vrot.lane.b32.xlu1 %v3039_v24, %s2676_s7 }
 0x289   : > { %1339 = vrot.lane.b32.xlu1 %v3039_v24, %s2677_s20 }
 0x2e7   : > { %v843_v26 = vpop.permute.xlu1 %842  ;;  %v1008_v28 = vpop.permute.xlu0 %1007 }
 0x2e8   : > { %2224 = vmatpush3.xpose.msk.msra.mxu1 %vm844_vm3, %v843_v26 }
 0x2e9   : > { %2228 = vmatprep.subr.mxu1 %v2669_v9 }
 0x2eb   : > { %2226 = vmatmul.mubr.msk.f32.vlgmr.msra.gmra.mxu1 %vm844_vm3, %v3039_v24  ;;  %v1010_v27 = vpop.permute.xlu1 %1009 }
 0x2ec   : > { %2234 = vmatpush3.xpose.msk.msra.mxu0 %vm844_vm3, %v1010_v27  ;;  %2230 = vmatprep.mubr.msk.f32.mxu1 %vm2670_vm2, %v2669_v9 }
 0x2ed   : > { %2243 = vmatprep.subr.mxu0 %v2669_v9 }
 0x2ef   : > { %2236 = vmatmul.mubr.msk.f32.vlgmr.msra.gmra.mxu0 %vm844_vm3, %v1008_v28  ;;  %v1176_v29 = vpop.permute.xlu1 %1175 }
 0x2f0   : > { %2244 = vmatpush3.xpose.msk.msra.mxu0 %vm844_vm3, %v1176_v29  ;;  %2245 = vmatprep.mubr.msk.f32.mxu0 %vm2670_vm2, %v2669_v9 }
 0x2f1   : > { %2253 = vmatprep.subr.mxu0 %v2669_v9 }
 0x2f3   : > { %v1174_v30 = vpop.permute.xlu1 %1173 }
 0x2f4   : > { %2246 = vmatmul.mubr.msk.f32.vlgmr.msra.gmra.mxu0 %vm844_vm3, %v1174_v30 }
 0x2f5   : > { %2255 = vmatprep.mubr.msk.f32.mxu0 %vm2670_vm2, %v2669_v9 }
 0x2f7   : > { %v1342_v31 = vpop.permute.xlu1 %1341 }
 0x2f8   : > { %2254 = vmatpush3.xpose.msk.msra.mxu0 %vm844_vm3, %v1342_v31 }
 0x2fb   : > { %v1340_v32 = vpop.permute.xlu1 %1339 }
 0x2fc   : > { %2256 = vmatmul.mubr.msk.f32.vlgmr.msra.gmra.mxu0 %vm844_vm3, %v1340_v32 }
 0x3ab   : > { %v915_v33 = vpop.f32.mrf.mxu1 }
 0x3ac   : > { %v919_v34 = vmul.f32 0.35355338, %v915_v33 }
 0x3ad   : > { %v2227_v35 = vpop.f32.mrf.mxu1 }
 0x3ae   : > { %v920_v36 = vsel %vm844_vm3, %v919_v34, -inf }
 0x3af   : > { %v1081_v37 = vpop.f32.mrf.mxu0  ;;  %921 = vmax.xlane.f32.xlu1 %v920_v36 }
 0x3b0   : > { %v1085_v38 = vmul.f32 0.35355338, %v1081_v37 }
 0x3b1   : > { %v2237_v39 = vpop.f32.mrf.mxu0 }
 0x3b2   : > { %v1086_v40 = vsel %vm844_vm3, %v1085_v38, -inf }
 0x3b3   : > { %1087 = vmax.xlane.f32.xlu0 %v1086_v40 }
 0x3b4   : > { %v1247_v41 = vpop.f32.mrf.mxu0 }
 0x3b5   : > { %v1251_v42 = vmul.f32 0.35355338, %v1247_v41 }
 0x3b6   : > { %v2247_v43 = vpop.f32.mrf.mxu0 }
 0x3b7   : > { %v1252_v44 = vsel %vm844_vm3, %v1251_v42, -inf }
 0x3b8   : > { %1253 = vmax.xlane.f32.xlu1 %v1252_v44 }
 0x3bc   : > { %v1413_v45 = vpop.f32.mrf.mxu0 }
 0x3bd   : > { %v1417_v46 = vmul.f32 0.35355338, %v1413_v45 }
 0x3be   : > { %v2257_v47 = vpop.f32.mrf.mxu0 }
 0x3bf   : > { %v1418_v48 = vsel %vm844_vm3, %v1417_v46, -inf }
 0x3c0   : > { %1419 = vmax.xlane.f32.xlu0 %v1418_v48 }
 0x3c9   : > { %931 = vrot.lane.b32.xlu1 %v3039_v24, %s2678_s26 }
 0x438   : > { %v922_v49 = vpop.xlane.xlu1 %921 }
 0x439   : > { %v923_v50 = vsub.f32 %v919_v34, %v922_v49 }
 0x43b   : > { %v924_v51 = vmul.f32 1.442695, %v923_v50 }
 0x43c   : > { %v1088_v52 = vpop.xlane.xlu0 %1087 }
 0x43d   : > { %2435 = vpow2.f32 %v924_v51  ;;  %v1089_v53 = vsub.f32 %v1085_v38, %v1088_v52 }
 0x43f   : > { %v1090_v54 = vmul.f32 1.442695, %v1089_v53 }
 0x441   : > { %2437 = vpow2.f32 %v1090_v54  ;;  %v1254_v55 = vpop.xlane.xlu1 %1253 }
 0x442   : > { %v1255_v56 = vsub.f32 %v1251_v42, %v1254_v55 }
 0x444   : > { %v1256_v57 = vmul.f32 1.442695, %v1255_v56 }
 0x445   : > { %v932_v58 = vpop.permute.xlu1 %931 }
 0x446   : > { %2439 = vpow2.f32 %v1256_v57  ;;  %2229 = vmatpush3.msra.mxu1 %v932_v58 }
 0x447   : > { %2238 = vmatprep.subr.mxu1 %v2669_v9 }
 0x449   : > { %v1420_v59 = vpop.xlane.xlu0 %1419 }
 0x44a   : > { %v2436_v60 = vpop.eup %2435  ;;  %v1421_v61 = vsub.f32 %v1417_v46, %v1420_v59 }
 0x44b   : > { %v926_v62 = vsel %vm844_vm3, %v2436_v60, 0.0 }
 0x44c   : > { %v1422_v63 = vmul.f32 1.442695, %v1421_v61  ;;  %927 = vadd.xlane.f32.xlu1 %v926_v62 }
 0x44e   : > { %v2438_v0 = vpop.eup %2437  ;;  %2441 = vpow2.f32 %v1422_v63 }
 0x44f   : > { %v1092_v2 = vsel %vm844_vm3, %v2438_v0, 0.0 }
 0x450   : > { %1093 = vadd.xlane.f32.xlu0 %v1092_v2 }
 0x453   : > { %v2440_v3 = vpop.eup %2439 }
 0x454   : > { %v1258_v4 = vsel %vm844_vm3, %v2440_v3, 0.0 }
 0x455   : > { %1259 = vadd.xlane.f32.xlu1 %v1258_v4 }
 0x45b   : > { %v2442_v5 = vpop.eup %2441 }
 0x45c   : > { %v1424_v6 = vsel %vm844_vm3, %v2442_v5, 0.0 }
 0x45d   : > { %1425 = vadd.xlane.f32.xlu0 %v1424_v6 }
 0x466   : > { %1263 = vrot.lane.b32.xlu1 %v3039_v24, %s2679_s28 }
 0x46a   : > { %1429 = vrot.lane.b32.xlu1 %v3039_v24, %s2680_s0 }
 0x473   : > { %1097 = vrot.lane.b32.xlu0 %v3039_v24, %s2681_s21 }
 0x4d5   : > { %v928_v7 = vpop.xlane.xlu1 %927 }
 0x4d6   : > { %2443 = vrcp.f32 %v928_v7 }
 0x4d9   : > { %v1094_v8 = vpop.xlane.xlu0 %1093 }
 0x4da   : > { %2445 = vrcp.f32 %v1094_v8 }
 0x4de   : > { %v1260_v10 = vpop.xlane.xlu1 %1259 }
 0x4df   : > { %2447 = vrcp.f32 %v1260_v10 }
 0x4e2   : > { %v1264_v15 = vpop.permute.xlu1 %1263 }
 0x4e3   : > { %v2444_v11 = vpop.eup %2443 }
 0x4e4   : > { %v930_v12 = vmul.f32 %v2444_v11, %v2436_v60 }
 0x4e6   : > { %v1426_v13 = vpop.xlane.xlu0 %1425  ;;  %2231 = vmatmul.mubr.msk.f32.vlgmr.msra.gmra.mxu1 %vm844_vm3, %v930_v12  ;;  %v1430_v20 = vpop.permute.xlu1 %1429 }
 0x4e7   : > { %v2446_v14 = vpop.eup %2445  ;;  %2449 = vrcp.f32 %v1426_v13  ;;  %2240 = vmatprep.mubr.msk.f32.mxu1 %vm2670_vm2, %v2669_v9 }
 0x4e8   : > { %v1096_v17 = vmul.f32 %v2446_v14, %v2438_v0 }
 0x4ea   : > { %v1098_v16 = vpop.permute.xlu0 %1097 }
 0x4eb   : > { %2239 = vmatpush3.msra.mxu1 %v1098_v16 }
 0x4ec   : > { %v2448_v18 = vpop.eup %2447  ;;  %2241 = vmatmul.mubr.msk.f32.vlgmr.msra.gmra.mxu1 %vm844_vm3, %v1096_v17  ;;  %2248 = vmatprep.subr.mxu1 %v2669_v9 }
 0x4ed   : > { %2249 = vmatpush3.msra.mxu1 %v1264_v15  ;;  %2250 = vmatprep.mubr.msk.f32.mxu1 %vm2670_vm2, %v2669_v9  ;;  %v1262_v19 = vmul.f32 %v2448_v18, %v2440_v3 }
 0x4ee   : > { %2258 = vmatprep.subr.mxu1 %v2669_v9 }
 0x4f0   : > { %2251 = vmatmul.mubr.msk.f32.vlgmr.msra.gmra.mxu1 %vm844_vm3, %v1262_v19 }
 0x4f1   : > { %2259 = vmatpush3.msra.mxu1 %v1430_v20  ;;  %2260 = vmatprep.mubr.msk.f32.mxu1 %vm2670_vm2, %v2669_v9 }
 0x4f4   : > { %v2450_v21 = vpop.eup %2449 }
 0x4f5   : > { %v1428_v22 = vmul.f32 %v2450_v21, %v2442_v5 }
 0x4f7   : > { %2261 = vmatmul.mubr.msk.f32.vlgmr.msra.gmra.mxu1 %vm844_vm3, %v1428_v22 }
 0x5a6   : > { %v1003_v23 = vpop.f32.mrf.mxu1 }
 0x5a8   : > { %v2232_v24 = vpop.f32.mrf.mxu1 }
 0x5ac   : > { %v1169_v25 = vpop.f32.mrf.mxu1 }
 0x5ad   : > { %1506 = vrot.lane.b32.xlu0 %v1169_v25, %s2682_s17 }
 0x5ae   : > { %v2242_v26 = vpop.f32.mrf.mxu1 }
 0x5b0   : > { %v1335_v27 = vpop.f32.mrf.mxu1 }
 0x5b1   : > { %1510 = vrot.lane.b32.xlu1 %v1335_v27, %s2683_s29 }
 0x5b2   : > { %v2252_v28 = vpop.f32.mrf.mxu1 }
 0x5b7   : > { %v1501_v29 = vpop.f32.mrf.mxu1 }
 0x5b8   : > { %1514 = vrot.lane.b32.xlu0 %v1501_v29, %s2684_s10 }
 0x5b9   : > { %v2262_v30 = vpop.f32.mrf.mxu1 }
 0x61f   : > { %v1507_v31 = vpop.permute.xlu0 %1506 }
 0x620   : > { %v1517_v33 = vsel %vm844_vm3, %v1003_v23, %v1507_v31 }
 0x623   : > { %v1511_v32 = vpop.permute.xlu1 %1510 }
 0x624   : > { %v1519_v34 = vsel %vm1518_vm4, %v1517_v33, %v1511_v32 }
 0x627   : > { %1525 = sbr.rel (%p2148_p1) target bundleno = 1582 (0x62e), region = 88 }
 0x62a   : > { %v1515_v35 = vpop.permute.xlu0 %1514 }
 0x62b   : > { %v1521_v36 = vsel %vm1520_vm5, %v1519_v34, %v1515_v35 }
 0x62c   : > { %1526 = vst.msk [vmem:[%s3000_s14] sm:$0xff] %vm844_vm3, %v930_v12  ;;  %2149 = vst.msk [vmem:[%s3000_s14 + $0x8] sm:$0xff] %vm844_vm3, %v1096_v17 }
 0x62d   : > { %2150 = vst.msk [vmem:[%s3000_s14 + $0x10] sm:$0xff] %vm844_vm3, %v1262_v19  ;;  %2151 = vst.msk [vmem:[%s3000_s14 + $0x18] sm:$0xff] %vm844_vm3, %v1428_v22 }
 0x62e PF: > { %s3358_s5 = sld [smem:[#allocation30_spill]]  ;;  %2263 = vmatprep.subr.mxu0 %v2669_v9  ;;  %2271 = vmatprep.mubr.msk.f32.mxu0 %vm2670_vm2, %v2669_v9  ;;  %v1651_v52 = vld [vmem:[%s2982_s1 + $0x18] sm:$0xff]  ;;  %v1650_v53 = vld [vmem:[%s2982_s1 + $0x10] sm:$0xff]  ;;  %v1648_v54 = vld [vmem:[%s2982_s1] sm:$0xff]  ;;  %vm1749_vm6 = vcmask 523264   ;;  %s1865_s28 = sshll.u32 %s3000_s14, 4  ;;  %s3176_s28 = int_to_ptr.vmem [resolvable:$true] %s1865_s28 }
 0x62f   : > { %2274 = vmatprep.subr.mxu1 %v2669_v9  ;;  %2282 = vmatprep.mubr.msk.f32.mxu1 %vm2670_vm2, %v2669_v9  ;;  %s3359_s22 = sld [smem:[#allocation35_spill]]  ;;  %v2155_v61 = vld [vmem:[%s701_s30] ss:$0 sm:$0xff]  ;;  %v1748_v0 = vld [vmem:[%s2996_s15 + $0x38] sm:$0xff]  ;;  %v1747_v2 = vld [vmem:[%s2996_s15 + $0x30] sm:$0xff]  ;;  %s2511_s18 = scalar_lea.vmem %s3176_s28, 512 }
 0x630   : > { %2275 = vmatpush3.msra.mxu1 %v1651_v52  ;;  %s3361_s16 = sld [smem:[#allocation36_spill]]  ;;  %v1746_v3 = vld [vmem:[%s2996_s15 + $0x28] sm:$0xff]  ;;  %v1745_v4 = vld [vmem:[%s2996_s15 + $0x20] sm:$0xff]  ;;  %v1744_v5 = vld [vmem:[%s2996_s15 + $0x18] sm:$0xff]  ;;  %p2512_p13 = scmp.ne.s32.totalorder %s3176_s28, %s2511_s18 }
 0x631   : > { %2276 = vmatprep.subr.mxu1 %v2669_v9  ;;  %v1743_v6 = vld [vmem:[%s2996_s15 + $0x10] sm:$0xff]  ;;  %v1742_v7 = vld [vmem:[%s2996_s15 + $0x8] sm:$0xff]  ;;  %v1741_v8 = vld [vmem:[%s2996_s15] sm:$0xff]  ;;  %s3365_s20 = sld [smem:[#allocation19_spill]] }
 0x632   : > { %2277 = vmatpush3.msra.mxu1 %v1650_v53  ;;  %v2156_v10 = vld [vmem:[%s709_s13] ss:$0 sm:$0xff]  ;;  %s3366_s26 = sld [smem:[#allocation29_spill]] }
 0x633   : > { %2278 = vmatprep.subr.mxu1 %v2669_v9  ;;  %s3367_s15 = sld [smem:[#allocation23_spill]] }
 0x634   : > { %v1536_v37 = vld [vmem:[%s3358_s5 + $0x18] sm:$0xff]  ;;  %v1535_v38 = vld [vmem:[%s3358_s5 + $0x10] sm:$0xff]  ;;  %v1534_v39 = vld [vmem:[%s3358_s5 + $0x8] sm:$0xff]  ;;  %s3368_s29 = sld [smem:[#allocation43_spill]] }
 0x635   : > { %2264 = vmatpush3.msra.mxu0 %v1536_v37  ;;  %v1533_v40 = vld [vmem:[%s3358_s5] sm:$0xff]  ;;  %s3360_s23 = scalar_lea.vmem %s3359_s22, %s2946_s9  ;;  %s2685_s22 = smov [#allocation8]  }
 0x636   : > { %2265 = vmatprep.subr.mxu0 %v2669_v9  ;;  %v2153_v42 = vld [vmem:[%s3360_s23] ss:$0 sm:$0xff]  ;;  %s3362_s24 = scalar_lea.vmem %s3361_s16, %s2946_s9  ;;  %s2515_s23 = sshll.u32 %s2685_s22, 4  ;;  %s2516_s23 = int_to_ptr.vmem [resolvable:$false] %s2515_s23 }
 0x637   : > { %2266 = vmatpush3.msra.mxu0 %v1535_v38  ;;  %v2154_v59 = vld [vmem:[%s3362_s24] ss:$0 sm:$0xff]  ;;  %s2171_s13 = sshll.u32 %s3365_s20, 9  ;;  %s2517_s14 = scalar_lea.vmem %s2516_s23, 1024 }
 0x638   : > { %2267 = vmatprep.subr.mxu0 %v2669_v9  ;;  %s1839_s19 = scalar_lea.sflag [#allocation9], %s3366_s26  ;;  %p2518_p9 = scmp.lt.s32.totalorder %s3176_s28, %s2516_s23 }
 0x639   : > { %2268 = vmatpush3.msra.mxu0 %v1534_v39  ;;  %p3370_p5 = scmp.ne.s32.totalorder %s3367_s15, 0  ;;  %p2519_p10 = scmp.lt.s32.totalorder %s2517_s14, %s2511_s18 }
 0x63a   : > { %2269 = vmatprep.subr.mxu0 %v2669_v9  ;;  %s3369_s10 = smov %s3368_s29  ;;  %s3174_s5 = scalar_lea.hbm %s3368_s29, %s2171_s13 }
 0x63b   : > { %2270 = vmatpush3.msra.mxu0 %v1533_v40  ;;  %p2513_p3 = pnand %p2512_p13, %p3370_p5  ;;  %p2520_p11 = por %p2519_p10, %p2518_p9 }
 0x63c   : > { %2272 = vmatmul.mubr.msk.f32.vlgmr.msra.gmra.mxu0 %vm728_vm1, %v1521_v36  ;;  %2285 = vmatprep.subr.mxu0 %v2669_v9 }
 0x63d   : > { %2301 = vmatprep.mubr.msk.f32.mxu0 %vm2670_vm2, %v2669_v9  ;;  %2286 = vmatpush3.msra.mxu0 %v1748_v0  ;;  %p2514_p4 = pneg %p2513_p3 }
 0x63e   : > { %2287 = vmatprep.subr.mxu0 %v2669_v9 }
 0x63f   : > { %2288 = vmatpush3.msra.mxu0 %v1747_v2  ;;  %p2521_p0 = pnand %p2520_p11, %p2514_p4 }
 0x640   : > { %2289 = vmatprep.subr.mxu0 %v2669_v9 }
 0x641   : > { %2290 = vmatpush3.msra.mxu0 %v1746_v3 }
 0x642   : > { %2291 = vmatprep.subr.mxu0 %v2669_v9 }
 0x643   : > { %2292 = vmatpush3.msra.mxu0 %v1745_v4 }
 0x644   : > { %2293 = vmatprep.subr.mxu0 %v2669_v9 }
 0x645   : > { %2294 = vmatpush3.msra.mxu0 %v1744_v5 }
 0x646   : > { %2295 = vmatprep.subr.mxu0 %v2669_v9 }
 0x647   : > { %2296 = vmatpush3.msra.mxu0 %v1743_v6 }
 0x648   : > { %2297 = vmatprep.subr.mxu0 %v2669_v9 }
 0x649   : > { %2298 = vmatpush3.msra.mxu0 %v1742_v7 }
 0x64a   : > { %2299 = vmatprep.subr.mxu0 %v2669_v9 }
 0x64b   : > { %2300 = vmatpush3.msra.mxu0 %v1741_v8 }
 0x6fc   : > { %v1606_v41 = vpop.f32.mrf.mxu0 }
 0x6fd   : > { %v1610_v43 = vadd.f32 %v1606_v41, %v3005_v1  ;;  %v1649_v1 = vld [vmem:[%s2982_s1 + $0x8] sm:$0xff] }
 0x6fe   : > { %v2273_v44 = vpop.f32.mrf.mxu0  ;;  %2279 = vmatpush3.msra.mxu1 %v1649_v1 }
 0x6ff   : > { %v3125_v45 = vadd.f32 %v2153_v42, %v1610_v43  ;;  %2280 = vmatprep.subr.mxu1 %v2669_v9 }
 0x700   : > { %2281 = vmatpush3.msra.mxu1 %v1648_v54 }
 0x701   : > { %v1621_v46 = vsel %vm728_vm1, %v3125_v45, 0.0 }
 0x702   : > { %1622 = vadd.xlane.f32.xlu0 %v1621_v46 }
 0x78b   : > { %v1623_v47 = vpop.xlane.xlu0 %1622 }
 0x78c   : > { %v1624_v48 = vmul.f32 0.03125, %v1623_v47 }
 0x78e   : > { %v1625_v49 = vsub.f32 %v3125_v45, %v1624_v48 }
 0x790   : > { %v1626_v50 = vmul.f32 %v1625_v49, %v1625_v49 }
 0x792   : > { %v1627_v51 = vsel %vm728_vm1, %v1626_v50, 0.0 }
 0x793   : > { %1628 = vadd.xlane.f32.xlu0 %v1627_v51 }
 0x81c   : > { %v1629_v55 = vpop.xlane.xlu0 %1628 }
 0x81d   : > { %v1630_v56 = vmul.f32 0.03125, %v1629_v55 }
 0x81f   : > { %v1631_v57 = vadd.f32 1e-05, %v1630_v56 }
 0x821   : > { %2451 = vrsqrt.f32 %v1631_v57 }
 0x82e   : > { %v2452_v58 = vpop.eup %2451 }
 0x82f   : > { %v1633_v60 = vmul.f32 %v2452_v58, %v1625_v49 }
 0x831   : > { %v1640_v62 = vmul.f32 %v2154_v59, %v1633_v60 }
 0x833   : > { %v1647_v63 = vadd.f32 %v2155_v61, %v1640_v62 }
 0x835   : > { %2283 = vmatmul.mubr.msk.f32.vlgmr.msra.gmra.mxu1 %vm728_vm1, %v1647_v63 }
 0x8f5   : > { %v1728_v11 = vpop.f32.mrf.mxu1 }
 0x8f6   : > { %v1729_v12 = vadd.f32 %v2156_v10, %v1728_v11 }
 0x8f7   : > { %v2284_v13 = vpop.f32.mrf.mxu1 }
 0x8f8   : > { %v1733_v14 = vmul.f32 0.044715, %v1729_v12  ;;  %v1732_v19 = vmul.f32 0.5, %v1729_v12 }
 0x8fa   : > { %v1734_v15 = vmul.f32 %v1733_v14, %v1729_v12 }
 0x8fc   : > { %v1735_v16 = vmul.f32 %v1734_v15, %v1729_v12 }
 0x8fe   : > { %v1736_v17 = vadd.f32 %v1735_v16, %v1729_v12 }
 0x900   : > { %v1737_v18 = vmul.f32 0.7978846, %v1736_v17 }
 0x902   : > { %2453 = vtanh.f32 %v1737_v18 }
 0x90f   : > { %v2454_v9 = vpop.eup %2453 }
 0x910   : > { %v1739_v20 = vadd.f32 1.0, %v2454_v9 }
 0x912   : > { %v1740_v21 = vmul.f32 %v1739_v20, %v1732_v19 }
 0x914   : > { %2302 = vmatmul.mubr.msk.f32.vlgmr.msra.gmra.mxu0 %vm1749_vm6, %v1740_v21 }
 0x915   : > { %2524 = shalt.err (!%p2521_p0)
}
 0x916   : > { %s2525_s12 = scalar_lea.hbm %s3174_s5, 512  ;;  %s2529_s24 = scalar_lea.hbm %s3369_s10, 1024 }
 0x917   : > { %p2526_p12 = scmp.ne.s32.totalorder %s3174_s5, %s2525_s12  ;;  %p2530_p8 = scmp.lt.s32.totalorder %s3174_s5, %s3369_s10 }
 0x918   : > { %p2531_p6 = scmp.lt.s32.totalorder %s2529_s24, %s2525_s12 }
 0x919   : > { %p2527_p2 = pnand %p2526_p12, %p3370_p5 }
 0x91a   : > { %p2532_p1 = por %p2531_p6, %p2530_p8 }
 0x91b   : > { %p2528_p7 = pneg %p2527_p2 }
 0x91d   : > { %p2533_p13 = pnand %p2532_p1, %p2528_p7 }
 0x91f   : > { %2536 = shalt.err (!%p2533_p13)
}
 0x920   : > { %s2686_s27 = smov 128   ;;  %v2159_v23 = vld [vmem:[%s717_s6] ss:$0 sm:$0xff]  ;;  %s2162_s13 = sshll.u32 %s3365_s20, 7 }
 0x921   : > { %2309 = dma.vmem_to_hbm [thread:$0]  (%p3370_p5), %s3176_s28, 512, %s3174_s5, %s1839_s19, %s2686_s27, %s2686_s27, %s2682_s17  }
 0x922   : > { %s1852_s0 = sshll.u32 %s2998_s3, 4  ;;  %s3372_s18 = sld [smem:[#allocation42_spill]]  ;;  %s1853_s0 = int_to_ptr.vmem [resolvable:$true] %s1852_s0 }
 0x923   : > { %s1834_s17 = scalar_lea.sflag [#allocation4], %s3366_s26  ;;  %s2537_s28 = scalar_lea.vmem %s1853_s0, 128 }
 0x924   : > { %p2538_p3 = scmp.ne.s32.totalorder %s1853_s0, %s2537_s28  ;;  %s2687_s6 = smov [#allocation7]  }
 0x925   : > { %s2541_s9 = sshll.u32 %s2687_s6, 4  ;;  %s2542_s9 = int_to_ptr.vmem [resolvable:$false] %s2541_s9 }
 0x926   : > { %p2539_p4 = pnand %p2538_p3, %p3370_p5  ;;  %s2543_s20 = scalar_lea.vmem %s2542_s9, 256 }
 0x927   : > { %p2544_p10 = scmp.lt.s32.totalorder %s1853_s0, %s2542_s9  ;;  %p2545_p11 = scmp.lt.s32.totalorder %s2543_s20, %s2537_s28 }
 0x928   : > { %s3373_s14 = smov %s3372_s18  ;;  %s1850_s22 = scalar_lea.hbm %s3372_s18, %s2162_s13 }
 0x929   : > { %p2540_p9 = pneg %p2539_p4  ;;  %p2546_p0 = por %p2545_p11, %p2544_p10 }
 0x92b   : > { %p2547_p12 = pnand %p2546_p0, %p2540_p9 }
 0x9d4   : > { %v1819_v22 = vpop.f32.mrf.mxu0 }
 0x9d5   : > { %v1823_v24 = vadd.f32 %v1819_v22, %v3125_v45 }
 0x9d6   : > { %v2303_v25 = vpop.f32.mrf.mxu0 }
 0x9d7   : > { %v1831_v26 = vadd.f32 %v2159_v23, %v1823_v24 }
 0x9d9   : > { %1832 = vst.msk [vmem:[%s2998_s3] sm:$0xff] %vm728_vm1, %v1831_v26 }
 0x9da   : > { %2550 = shalt.err (!%p2547_p12)
}
 0x9db   : > { %s2551_s5 = scalar_lea.hbm %s1850_s22, 128  ;;  %s2555_s19 = scalar_lea.hbm %s3373_s14, 256 }
 0x9dc   : > { %p2552_p2 = scmp.ne.s32.totalorder %s1850_s22, %s2551_s5  ;;  %p2556_p6 = scmp.lt.s32.totalorder %s1850_s22, %s3373_s14 }
 0x9dd   : > { %p2557_p1 = scmp.lt.s32.totalorder %s2555_s19, %s2551_s5 }
 0x9de   : > { %p2553_p7 = pnand %p2552_p2, %p3370_p5 }
 0x9df   : > { %p2558_p13 = por %p2557_p1, %p2556_p6 }
 0x9e0   : > { %p2554_p8 = pneg %p2553_p7 }
 0x9e2   : > { %p2559_p3 = pnand %p2558_p13, %p2554_p8 }
 0x9e4   : > { %2562 = shalt.err (!%p2559_p3)
}
 0x9e5   : > { %2308 = dma.vmem_to_hbm [thread:$0]  (%p3370_p5), %s1853_s0, 128, %s1850_s22, %s1834_s17  }
 0x9e6 PF: > { %s3374_s8 = sld [smem:[#allocation22_spill]] }
 0x9e7   : > { %s3375_s16 = sld [smem:[#allocation16_spill]] }
 0x9e8   : > { %s3376_s24 = sld [smem:[#allocation24_spill]] }
 0x9ec   : > { %p2327_p4 = scmp.ge.s32.totalorder %s3374_s8, 2 }
 0x9ed   : > { %s1880_s1 = sand.u32 1, %s3375_s16  }
 0x9ee   : > { %p3377_p9 = scmp.ne.s32.totalorder %s3376_s24, 0  ;;  %s1881_s25 = scalar_lea.sflag [#allocation4], %s1880_s1 }
 0x9f0   : > { %p2320_p10 = pnand %p2327_p4, %p3377_p9 }
 0x9f2   : > { %p2321_p11 = pneg %p2320_p10 }
 0x9f4   : > { %2616 = dma.done.wait (%p2321_p11), %s1881_s25, 128  }
 0x9f5   : > { %2618 = vsyncadd (%p2321_p11), %s1881_s25, 4294967168  ;;  %s1890_s27 = scalar_lea.sflag [#allocation9], %s1880_s1 }
 0x9f6   : > { %2620 = dma.done.wait (%p2321_p11), %s1890_s27, 512  }
 0x9f7   : > { %2622 = vsyncadd (%p2321_p11), %s1890_s27, 4294966784  ;;  %s37_s23 = sadd.s32 1, %s3374_s8   ;;  %s3378_s29 = sld [smem:[#allocation14_spill]] }
 0x9f8   : > { %p34_p0 = scmp.ge.s32.totalorder %s37_s23, 6   ;;  %s3379_s30 = sld [smem:[#allocation15_spill]] }
 0x9f9   : > { %s3380_s15 = sld [smem:[#allocation27_spill]] }
 0x9fa   : > { %s3381_s16 = sld [smem:[#allocation17_spill]] }
 0x9fb   : > { %s3382_s17 = sld [smem:[#allocation18_spill]] }
 0x9fc   : > { %s3383_s18 = sld [smem:[#allocation28_spill]]  ;;  %36 = sbr.rel (!%p34_p0) target bundleno = 27 (0x1b), region = 191 }
 0x9fd   : > { %s3384_s19 = sld [smem:[#allocation20_spill]] }
 0x9fe   : > { %s3385_s20 = sld [smem:[#allocation21_spill]] }
 0x9ff   : > { %s3386_s21 = sld [smem:[#allocation25_spill]] }
 0xa00   : > { %s3387_s22 = sld [smem:[#allocation26_spill]] }
 0xa01   :  { %1895 = vsyncpa [#allocation3], 1 }
 0xa02   :  { %1897 = vsyncpa [#allocation3 + $0x1], 1 }
 0xa03   :  { %1898 = vsyncpa [#allocation6], 1 }
 0xa04   :  { %1900 = vsyncpa [#allocation6 + $0x1], 1 }
 0xa05   :  { %1901 = vsyncpa [#allocation4], 1 }
 0xa06   :  { %1903 = vsyncpa [#allocation4 + $0x1], 1 }
 0xa07   :  { %1904 = vsyncpa [#allocation9], 1 }
 0xa08   :  { %1906 = vsyncpa [#allocation9 + $0x1], 1 }

</bundles_post_ra>
